<compile_context>
chip_gen: v5e
topology: v5e:2x2
jax: 0.10.0
libtpu: 0.0.40
codegen_flags: <defaults>
</compile_context>

<pallas_src>
import jax
import jax.numpy as jnp
from jax import lax
from jax.experimental import pallas as pl
from jax.experimental.pallas import tpu as pltpu

SEQ = 8        # word_len
INPUT = 16     # input_size
HIDDEN = 32    # hidden_size
NTAGS = 3      # out_features of hidden2tag
NUM_LAYERS = 2

H = HIDDEN
G8 = 8 * H     # fused fwd+bwd gate width (256 lanes)

# Row offsets inside the packed weight slab (all multiples of 8 -> tile-aligned ref slices).
_IH0 = 0                       # (INPUT, 8H)
_HH0 = _IH0 + INPUT            # (2H, 8H)  block-diagonal
_IH1 = _HH0 + 2 * H            # (2H, 8H)
_HH1 = _IH1 + 2 * H            # (2H, 8H)  block-diagonal
_WROWS = _HH1 + 2 * H          # 208


def _ner_kernel(x_ref, w_ref, b_ref, tag_ref, out_ref, hf_ref, hb_ref):
    T = SEQ

    # Lane mask: within each 2H gate pair, lanes [H:2H) belong to the backward direction.
    lane = lax.broadcasted_iota(jnp.int32, (1, G8), 1)
    bwd_lane = (lane & (2 * H - 1)) >= H          # (1, 8H) bool

    def run_layer(layer_in, w_ih, w_hh, b):
        # Hoisted input projection for BOTH directions: one (T, in) @ (in, 8H) matmul.
        gx = jnp.dot(layer_in, w_ih, preferred_element_type=jnp.float32) + b    # (T, 8H)

        h_cat = jnp.zeros((1, 2 * H), jnp.float32)   # [h_fwd | h_bwd]
        c_cat = jnp.zeros((1, 2 * H), jnp.float32)

        # Fully unrolled recurrence; fwd step i and bwd step T-1-i share one MXU op,
        # one tanh over 8H lanes and one set of elementwise updates over 2H lanes.
        for i in range(T):
            j = T - 1 - i
            # fwd gate lanes take input row i, bwd gate lanes take input row T-1-i.
            gx_row = jnp.where(bwd_lane, gx[j:j + 1, :], gx[i:i + 1, :])         # (1, 8H)
            gates = gx_row + jnp.dot(h_cat, w_hh,
                                     preferred_element_type=jnp.float32)        # (1, 8H)
            # Single EUP push: i/f/o columns were pre-scaled by 0.5 host-side, so
            # sigmoid(x) = 0.5 * tanh(x/2) + 0.5.
            th = jnp.tanh(gates)
            i_g = th[:, 0:2 * H] * 0.5 + 0.5
            f_g = th[:, 2 * H:4 * H] * 0.5 + 0.5
            g_g = th[:, 4 * H:6 * H]
            o_g = th[:, 6 * H:8 * H] * 0.5 + 0.5
            c_cat = f_g * c_cat + i_g * g_g
            h_cat = o_g * jnp.tanh(c_cat)                                        # (1, 2H)
            # fwd half belongs to output row i, bwd half to output row T-1-i.
            hf_ref[i:i + 1, :] = h_cat[:, 0:H]
            hb_ref[j:j + 1, :] = h_cat[:, H:2 * H]

        return jnp.concatenate([hf_ref[...], hb_ref[...]], axis=1)               # (T, 2H)

    x = x_ref[...]                                                               # (T, INPUT)

    # ---- LSTM layer 0 (INPUT -> H, both directions) ----
    h0 = run_layer(x,
                   w_ref[_IH0:_IH0 + INPUT, :],
                   w_ref[_HH0:_HH0 + 2 * H, :],
                   b_ref[0:1, :])

    # TODO(synk): nn.LSTM(dropout=0.5) applies dropout to layer-0 outputs only in
    # training mode; inference (eval) semantics are implemented here.

    # ---- LSTM layer 1 (2H -> H, both directions) ----
    h1 = run_layer(h0,
                   w_ref[_IH1:_IH1 + 2 * H, :],
                   w_ref[_HH1:_HH1 + 2 * H, :],
                   b_ref[1:2, :])

    # ---- hidden2tag + log_softmax (explicit 3-lane max/sum; no lane-reduce) ----
    w_tag = tag_ref[0:2 * H, :]
    b_tag = tag_ref[2 * H:2 * H + 1, :]
    logits = jnp.dot(h1, w_tag, preferred_element_type=jnp.float32) + b_tag      # (T, 3)
    l0 = logits[:, 0:1]
    l1 = logits[:, 1:2]
    l2 = logits[:, 2:3]
    m = jnp.maximum(jnp.maximum(l0, l1), l2)
    lse = m + jnp.log(jnp.exp(l0 - m) + jnp.exp(l1 - m) + jnp.exp(l2 - m))
    out_ref[...] = logits - lse


def entity_recognizer_forward(words, packed):
    buf_w, buf_b, buf_tag = packed
    vmem = pl.BlockSpec(memory_space=pltpu.MemorySpace.VMEM)
    return pl.pallas_call(
        _ner_kernel,
        out_shape=jax.ShapeDtypeStruct((SEQ, NTAGS), jnp.float32),
        in_specs=[vmem, vmem, vmem, vmem],
        out_specs=vmem,
        scratch_shapes=[pltpu.VMEM((SEQ, H), jnp.float32),    # fwd hidden rows
                        pltpu.VMEM((SEQ, H), jnp.float32)],   # bwd hidden rows
    )(words, buf_w, buf_b, buf_tag)


# ----------------------------- host-side parameters -----------------------------

def init_params(key):
    """Deterministic synthetic parameters in PyTorch-equivalent layout:
    per layer/direction w_ih (in, 4H), w_hh (H, 4H), b (1, 4H) = b_ih + b_hh,
    gate order [i, f, g, o]; plus w_tag (2H, 3), b_tag (1, 3)."""
    keys = iter(jax.random.split(key, 32))

    def w(shape):
        fan_in, fan_out = shape
        std = (2.0 / (fan_in + fan_out)) ** 0.5
        return (std * jax.random.normal(next(keys), shape)).astype(jnp.float32)

    params = []
    # layer 0 fwd, layer 0 bwd, layer 1 fwd, layer 1 bwd
    for in_dim in (INPUT, INPUT, 2 * H, 2 * H):
        params += [w((in_dim, 4 * H)),
                   w((H, 4 * H)),
                   (0.01 * jax.random.normal(next(keys), (1, 4 * H))).astype(jnp.float32)]
    params += [w((2 * H, NTAGS)),
               (0.01 * jax.random.normal(next(keys), (1, NTAGS))).astype(jnp.float32)]
    return params


_GATE_SCALE = (0.5, 0.5, 1.0, 0.5)   # i, f, g, o — 0.5 implements sigmoid via tanh


def _fuse_gate_cols(mf, mb):
    """Interleave fwd/bwd gate column blocks: [i_f i_b | f_f f_b | g_f g_b | o_f o_b]."""
    cols = []
    for g, s in enumerate(_GATE_SCALE):
        cols.append(s * mf[:, g * H:(g + 1) * H])
        cols.append(s * mb[:, g * H:(g + 1) * H])
    return jnp.concatenate(cols, axis=1)


def _fuse_hh_blockdiag(wf, wb):
    """(2H, 8H) block-diagonal recurrent weight for LHS [h_fwd | h_bwd]."""
    z = jnp.zeros((H, H), jnp.float32)
    cols = []
    for g, s in enumerate(_GATE_SCALE):
        cols.append(jnp.concatenate([s * wf[:, g * H:(g + 1) * H], z], axis=0))
        cols.append(jnp.concatenate([z, s * wb[:, g * H:(g + 1) * H]], axis=0))
    return jnp.concatenate(cols, axis=1)


def pack_params(params):
    """Pack the 14 PyTorch-layout arrays into 3 DMA-friendly buffers."""
    (w_ih0f, w_hh0f, b0f, w_ih0b, w_hh0b, b0b,
     w_ih1f, w_hh1f, b1f, w_ih1b, w_hh1b, b1b, w_tag, b_tag) = params
    buf_w = jnp.concatenate([
        _fuse_gate_cols(w_ih0f, w_ih0b),        # rows   0: 16
        _fuse_hh_blockdiag(w_hh0f, w_hh0b),     # rows  16: 80
        _fuse_gate_cols(w_ih1f, w_ih1b),        # rows  80:144
        _fuse_hh_blockdiag(w_hh1f, w_hh1b),     # rows 144:208
    ], axis=0)                                  # (208, 256)
    buf_b = jnp.concatenate([
        _fuse_gate_cols(b0f, b0b),              # (1, 256)
        _fuse_gate_cols(b1f, b1b),              # (1, 256)
    ], axis=0)                                  # (2, 256)
    buf_tag = jnp.concatenate([w_tag, b_tag], axis=0)   # (65, 3): weight rows + bias row
    return buf_w, buf_b, buf_tag


# ----------------------------- pure-JAX reference -----------------------------

def reference_forward(x, params):
    """Pure-JAX reference matching PyTorch LSTM/Linear/log_softmax eval semantics."""
    P = jax.lax.Precision.HIGHEST
    T = x.shape[0]

    def run_dir(inp, w_ih, w_hh, b, reverse):
        h = jnp.zeros((1, H), jnp.float32)
        c = jnp.zeros((1, H), jnp.float32)
        outs = [None] * T
        order = range(T - 1, -1, -1) if reverse else range(T)
        for t in order:
            gates = (jnp.dot(inp[t:t + 1], w_ih, precision=P)
                     + jnp.dot(h, w_hh, precision=P) + b)
            i_g = jax.nn.sigmoid(gates[:, 0:H])
            f_g = jax.nn.sigmoid(gates[:, H:2 * H])
            g_g = jnp.tanh(gates[:, 2 * H:3 * H])
            o_g = jax.nn.sigmoid(gates[:, 3 * H:4 * H])
            c = f_g * c + i_g * g_g
            h = o_g * jnp.tanh(c)
            outs[t] = h
        return jnp.concatenate(outs, axis=0)

    layer_in = x
    for l in range(NUM_LAYERS):
        wf_ih, wf_hh, bf = params[l * 6:l * 6 + 3]
        wb_ih, wb_hh, bb = params[l * 6 + 3:l * 6 + 6]
        fwd = run_dir(layer_in, wf_ih, wf_hh, bf, False)
        bwd = run_dir(layer_in, wb_ih, wb_hh, bb, True)
        layer_in = jnp.concatenate([fwd, bwd], axis=1)
    w_tag, b_tag = params[12], params[13]
    logits = jnp.dot(layer_in, w_tag, precision=P) + b_tag
    return jax.nn.log_softmax(logits, axis=1)


if __name__ == "__main__":
    key = jax.random.PRNGKey(0)
    k_x, k_p = jax.random.split(key)
    words = jax.random.normal(k_x, (SEQ, INPUT), jnp.float32)   # word_len=8, input_size=16
    params = init_params(k_p)
    packed = pack_params(params)

    tag_scores = entity_recognizer_forward(words, packed)
    tag_scores = jax.block_until_ready(tag_scores)

    ref = reference_forward(words, params)
    assert tag_scores.shape == (SEQ, NTAGS)
    # Tolerance covers TPU MXU f32 matmul precision vs the HIGHEST-precision XLA reference;
    # semantic errors (gate order / time direction) would show up as O(0.1+) mismatches.
    assert jnp.allclose(tag_scores, ref, atol=1e-3, rtol=1e-3), "mismatch vs JAX reference"

    print("KERNEL_OK")
</pallas_src>

<mosaic_0001>
module attributes {stable_mosaic.version = 11 : i64} {
  func.func @_ner_kernel(%arg0: memref<8x16xf32, #tpu.memory_space<vmem>>, %arg1: memref<208x256xf32, #tpu.memory_space<vmem>>, %arg2: memref<2x256xf32, #tpu.memory_space<vmem>>, %arg3: memref<65x3xf32, #tpu.memory_space<vmem>>, %arg4: memref<8x3xf32, #tpu.memory_space<vmem>>, %arg5: memref<8x32xf32, #tpu.memory_space<vmem>>, %arg6: memref<8x32xf32, #tpu.memory_space<vmem>>) attributes {dimension_semantics = [], scalar_prefetch = 0 : i64, scratch_operands = 2 : i64, tpu.core_type = #tpu.core_type<tc>} {
    %0 = tpu.iota {dimensions = array<i32: 1>} : vector<1x256xi32>
    %c63_i32 = arith.constant 63 : i32
    %1 = vector.broadcast %c63_i32 : i32 to vector<1x256xi32>
    %2 = arith.andi %0, %1 : vector<1x256xi32>
    %c32_i32 = arith.constant 32 : i32
    %3 = vector.broadcast %c32_i32 : i32 to vector<1x256xi32>
    %4 = arith.cmpi sge, %2, %3 : vector<1x256xi32>
    %c0 = arith.constant 0 : index
    %c0_0 = arith.constant 0 : index
    %5 = vector.load %arg0[%c0, %c0_0] : memref<8x16xf32, #tpu.memory_space<vmem>>, vector<8x16xf32>
    %c0_1 = arith.constant 0 : index
    %c0_2 = arith.constant 0 : index
    %6 = vector.load %arg1[%c0_1, %c0_2] : memref<208x256xf32, #tpu.memory_space<vmem>>, vector<16x256xf32>
    %c16 = arith.constant 16 : index
    %c0_3 = arith.constant 0 : index
    %7 = vector.load %arg1[%c16, %c0_3] : memref<208x256xf32, #tpu.memory_space<vmem>>, vector<64x256xf32>
    %c0_4 = arith.constant 0 : index
    %c0_5 = arith.constant 0 : index
    %8 = vector.load %arg2[%c0_4, %c0_5] : memref<2x256xf32, #tpu.memory_space<vmem>>, vector<1x256xf32>
    %cst = arith.constant dense<0.000000e+00> : vector<8x256xf32>
    %9 = tpu.matmul %5, %6, %cst {dimension_numbers = #tpu.dot_dimension_numbers<[1], [0], [0], [1], [0, 0, 1, 1], [], []>} : vector<8x16xf32>, vector<16x256xf32>, vector<8x256xf32> -> vector<8x256xf32>
    %10 = vector.broadcast %8 : vector<1x256xf32> to vector<8x256xf32>
    %11 = arith.addf %9, %10 : vector<8x256xf32>
    %cst_6 = arith.constant 0.000000e+00 : f32
    %12 = vector.broadcast %cst_6 : f32 to vector<1x64xf32>
    %cst_7 = arith.constant 0.000000e+00 : f32
    %13 = vector.broadcast %cst_7 : f32 to vector<1x64xf32>
    %14 = vector.extract_strided_slice %11 {offsets = [7, 0], sizes = [1, 256], strides = [1, 1]} : vector<8x256xf32> to vector<1x256xf32>
    %15 = vector.extract_strided_slice %11 {offsets = [0, 0], sizes = [1, 256], strides = [1, 1]} : vector<8x256xf32> to vector<1x256xf32>
    %16 = arith.select %4, %14, %15 : vector<1x256xi1>, vector<1x256xf32>
    %cst_8 = arith.constant dense<0.000000e+00> : vector<1x256xf32>
    %17 = tpu.matmul %12, %7, %cst_8 {dimension_numbers = #tpu.dot_dimension_numbers<[1], [0], [0], [1], [0, 0, 1, 1], [], []>} : vector<1x64xf32>, vector<64x256xf32>, vector<1x256xf32> -> vector<1x256xf32>
    %18 = arith.addf %16, %17 : vector<1x256xf32>
    %19 = math.tanh %18 : vector<1x256xf32>
    %20 = vector.extract_strided_slice %19 {offsets = [0, 0], sizes = [1, 64], strides = [1, 1]} : vector<1x256xf32> to vector<1x64xf32>
    %cst_9 = arith.constant 5.000000e-01 : f32
    %21 = vector.broadcast %cst_9 : f32 to vector<1x64xf32>
    %22 = arith.mulf %20, %21 : vector<1x64xf32>
    %cst_10 = arith.constant 5.000000e-01 : f32
    %23 = vector.broadcast %cst_10 : f32 to vector<1x64xf32>
    %24 = arith.addf %22, %23 : vector<1x64xf32>
    %25 = vector.extract_strided_slice %19 {offsets = [0, 64], sizes = [1, 64], strides = [1, 1]} : vector<1x256xf32> to vector<1x64xf32>
    %cst_11 = arith.constant 5.000000e-01 : f32
    %26 = vector.broadcast %cst_11 : f32 to vector<1x64xf32>
    %27 = arith.mulf %25, %26 : vector<1x64xf32>
    %cst_12 = arith.constant 5.000000e-01 : f32
    %28 = vector.broadcast %cst_12 : f32 to vector<1x64xf32>
    %29 = arith.addf %27, %28 : vector<1x64xf32>
    %30 = vector.extract_strided_slice %19 {offsets = [0, 128], sizes = [1, 64], strides = [1, 1]} : vector<1x256xf32> to vector<1x64xf32>
    %31 = vector.extract_strided_slice %19 {offsets = [0, 192], sizes = [1, 64], strides = [1, 1]} : vector<1x256xf32> to vector<1x64xf32>
    %cst_13 = arith.constant 5.000000e-01 : f32
    %32 = vector.broadcast %cst_13 : f32 to vector<1x64xf32>
    %33 = arith.mulf %31, %32 : vector<1x64xf32>
    %cst_14 = arith.constant 5.000000e-01 : f32
    %34 = vector.broadcast %cst_14 : f32 to vector<1x64xf32>
    %35 = arith.addf %33, %34 : vector<1x64xf32>
    %36 = arith.mulf %29, %13 : vector<1x64xf32>
    %37 = arith.mulf %24, %30 : vector<1x64xf32>
    %38 = arith.addf %36, %37 : vector<1x64xf32>
    %39 = math.tanh %38 : vector<1x64xf32>
    %40 = arith.mulf %35, %39 : vector<1x64xf32>
    %41 = vector.extract_strided_slice %40 {offsets = [0, 0], sizes = [1, 32], strides = [1, 1]} : vector<1x64xf32> to vector<1x32xf32>
    %c0_15 = arith.constant 0 : index
    %c0_16 = arith.constant 0 : index
    %42 = vector.load %arg5[%c0_15, %c0_16] : memref<8x32xf32, #tpu.memory_space<vmem>>, vector<1x32xf32>
    tpu.vector_store %arg5[%c0_15, %c0_16], %41 {strides = array<i32>} : memref<8x32xf32, #tpu.memory_space<vmem>>, vector<1x32xf32>,
    %43 = vector.extract_strided_slice %40 {offsets = [0, 32], sizes = [1, 32], strides = [1, 1]} : vector<1x64xf32> to vector<1x32xf32>
    %c7 = arith.constant 7 : index
    %c0_17 = arith.constant 0 : index
    %44 = vector.load %arg6[%c7, %c0_17] : memref<8x32xf32, #tpu.memory_space<vmem>>, vector<1x32xf32>
    tpu.vector_store %arg6[%c7, %c0_17], %43 {strides = array<i32>} : memref<8x32xf32, #tpu.memory_space<vmem>>, vector<1x32xf32>,
    %45 = vector.extract_strided_slice %11 {offsets = [6, 0], sizes = [1, 256], strides = [1, 1]} : vector<8x256xf32> to vector<1x256xf32>
    %46 = vector.extract_strided_slice %11 {offsets = [1, 0], sizes = [1, 256], strides = [1, 1]} : vector<8x256xf32> to vector<1x256xf32>
    %47 = arith.select %4, %45, %46 : vector<1x256xi1>, vector<1x256xf32>
    %cst_18 = arith.constant dense<0.000000e+00> : vector<1x256xf32>
    %48 = tpu.matmul %40, %7, %cst_18 {dimension_numbers = #tpu.dot_dimension_numbers<[1], [0], [0], [1], [0, 0, 1, 1], [], []>} : vector<1x64xf32>, vector<64x256xf32>, vector<1x256xf32> -> vector<1x256xf32>
    %49 = arith.addf %47, %48 : vector<1x256xf32>
    %50 = math.tanh %49 : vector<1x256xf32>
    %51 = vector.extract_strided_slice %50 {offsets = [0, 0], sizes = [1, 64], strides = [1, 1]} : vector<1x256xf32> to vector<1x64xf32>
    %cst_19 = arith.constant 5.000000e-01 : f32
    %52 = vector.broadcast %cst_19 : f32 to vector<1x64xf32>
    %53 = arith.mulf %51, %52 : vector<1x64xf32>
    %cst_20 = arith.constant 5.000000e-01 : f32
    %54 = vector.broadcast %cst_20 : f32 to vector<1x64xf32>
    %55 = arith.addf %53, %54 : vector<1x64xf32>
    %56 = vector.extract_strided_slice %50 {offsets = [0, 64], sizes = [1, 64], strides = [1, 1]} : vector<1x256xf32> to vector<1x64xf32>
    %cst_21 = arith.constant 5.000000e-01 : f32
    %57 = vector.broadcast %cst_21 : f32 to vector<1x64xf32>
    %58 = arith.mulf %56, %57 : vector<1x64xf32>
    %cst_22 = arith.constant 5.000000e-01 : f32
    %59 = vector.broadcast %cst_22 : f32 to vector<1x64xf32>
    %60 = arith.addf %58, %59 : vector<1x64xf32>
    %61 = vector.extract_strided_slice %50 {offsets = [0, 128], sizes = [1, 64], strides = [1, 1]} : vector<1x256xf32> to vector<1x64xf32>
    %62 = vector.extract_strided_slice %50 {offsets = [0, 192], sizes = [1, 64], strides = [1, 1]} : vector<1x256xf32> to vector<1x64xf32>
    %cst_23 = arith.constant 5.000000e-01 : f32
    %63 = vector.broadcast %cst_23 : f32 to vector<1x64xf32>
    %64 = arith.mulf %62, %63 : vector<1x64xf32>
    %cst_24 = arith.constant 5.000000e-01 : f32
    %65 = vector.broadcast %cst_24 : f32 to vector<1x64xf32>
    %66 = arith.addf %64, %65 : vector<1x64xf32>
    %67 = arith.mulf %60, %38 : vector<1x64xf32>
    %68 = arith.mulf %55, %61 : vector<1x64xf32>
    %69 = arith.addf %67, %68 : vector<1x64xf32>
    %70 = math.tanh %69 : vector<1x64xf32>
    %71 = arith.mulf %66, %70 : vector<1x64xf32>
    %72 = vector.extract_strided_slice %71 {offsets = [0, 0], sizes = [1, 32], strides = [1, 1]} : vector<1x64xf32> to vector<1x32xf32>
    %c1 = arith.constant 1 : index
    %c0_25 = arith.constant 0 : index
    %73 = vector.load %arg5[%c1, %c0_25] : memref<8x32xf32, #tpu.memory_space<vmem>>, vector<1x32xf32>
    tpu.vector_store %arg5[%c1, %c0_25], %72 {strides = array<i32>} : memref<8x32xf32, #tpu.memory_space<vmem>>, vector<1x32xf32>,
    %74 = vector.extract_strided_slice %71 {offsets = [0, 32], sizes = [1, 32], strides = [1, 1]} : vector<1x64xf32> to vector<1x32xf32>
    %c6 = arith.constant 6 : index
    %c0_26 = arith.constant 0 : index
    %75 = vector.load %arg6[%c6, %c0_26] : memref<8x32xf32, #tpu.memory_space<vmem>>, vector<1x32xf32>
    tpu.vector_store %arg6[%c6, %c0_26], %74 {strides = array<i32>} : memref<8x32xf32, #tpu.memory_space<vmem>>, vector<1x32xf32>,
    %76 = vector.extract_strided_slice %11 {offsets = [5, 0], sizes = [1, 256], strides = [1, 1]} : vector<8x256xf32> to vector<1x256xf32>
    %77 = vector.extract_strided_slice %11 {offsets = [2, 0], sizes = [1, 256], strides = [1, 1]} : vector<8x256xf32> to vector<1x256xf32>
    %78 = arith.select %4, %76, %77 : vector<1x256xi1>, vector<1x256xf32>
    %cst_27 = arith.constant dense<0.000000e+00> : vector<1x256xf32>
    %79 = tpu.matmul %71, %7, %cst_27 {dimension_numbers = #tpu.dot_dimension_numbers<[1], [0], [0], [1], [0, 0, 1, 1], [], []>} : vector<1x64xf32>, vector<64x256xf32>, vector<1x256xf32> -> vector<1x256xf32>
    %80 = arith.addf %78, %79 : vector<1x256xf32>
    %81 = math.tanh %80 : vector<1x256xf32>
    %82 = vector.extract_strided_slice %81 {offsets = [0, 0], sizes = [1, 64], strides = [1, 1]} : vector<1x256xf32> to vector<1x64xf32>
    %cst_28 = arith.constant 5.000000e-01 : f32
    %83 = vector.broadcast %cst_28 : f32 to vector<1x64xf32>
    %84 = arith.mulf %82, %83 : vector<1x64xf32>
    %cst_29 = arith.constant 5.000000e-01 : f32
    %85 = vector.broadcast %cst_29 : f32 to vector<1x64xf32>
    %86 = arith.addf %84, %85 : vector<1x64xf32>
    %87 = vector.extract_strided_slice %81 {offsets = [0, 64], sizes = [1, 64], strides = [1, 1]} : vector<1x256xf32> to vector<1x64xf32>
    %cst_30 = arith.constant 5.000000e-01 : f32
    %88 = vector.broadcast %cst_30 : f32 to vector<1x64xf32>
    %89 = arith.mulf %87, %88 : vector<1x64xf32>
    %cst_31 = arith.constant 5.000000e-01 : f32
    %90 = vector.broadcast %cst_31 : f32 to vector<1x64xf32>
    %91 = arith.addf %89, %90 : vector<1x64xf32>
    %92 = vector.extract_strided_slice %81 {offsets = [0, 128], sizes = [1, 64], strides = [1, 1]} : vector<1x256xf32> to vector<1x64xf32>
    %93 = vector.extract_strided_slice %81 {offsets = [0, 192], sizes = [1, 64], strides = [1, 1]} : vector<1x256xf32> to vector<1x64xf32>
    %cst_32 = arith.constant 5.000000e-01 : f32
    %94 = vector.broadcast %cst_32 : f32 to vector<1x64xf32>
    %95 = arith.mulf %93, %94 : vector<1x64xf32>
    %cst_33 = arith.constant 5.000000e-01 : f32
    %96 = vector.broadcast %cst_33 : f32 to vector<1x64xf32>
    %97 = arith.addf %95, %96 : vector<1x64xf32>
    %98 = arith.mulf %91, %69 : vector<1x64xf32>
    %99 = arith.mulf %86, %92 : vector<1x64xf32>
    %100 = arith.addf %98, %99 : vector<1x64xf32>
    %101 = math.tanh %100 : vector<1x64xf32>
    %102 = arith.mulf %97, %101 : vector<1x64xf32>
    %103 = vector.extract_strided_slice %102 {offsets = [0, 0], sizes = [1, 32], strides = [1, 1]} : vector<1x64xf32> to vector<1x32xf32>
    %c2 = arith.constant 2 : index
    %c0_34 = arith.constant 0 : index
    %104 = vector.load %arg5[%c2, %c0_34] : memref<8x32xf32, #tpu.memory_space<vmem>>, vector<1x32xf32>
    tpu.vector_store %arg5[%c2, %c0_34], %103 {strides = array<i32>} : memref<8x32xf32, #tpu.memory_space<vmem>>, vector<1x32xf32>,
    %105 = vector.extract_strided_slice %102 {offsets = [0, 32], sizes = [1, 32], strides = [1, 1]} : vector<1x64xf32> to vector<1x32xf32>
    %c5 = arith.constant 5 : index
    %c0_35 = arith.constant 0 : index
    %106 = vector.load %arg6[%c5, %c0_35] : memref<8x32xf32, #tpu.memory_space<vmem>>, vector<1x32xf32>
    tpu.vector_store %arg6[%c5, %c0_35], %105 {strides = array<i32>} : memref<8x32xf32, #tpu.memory_space<vmem>>, vector<1x32xf32>,
    %107 = vector.extract_strided_slice %11 {offsets = [4, 0], sizes = [1, 256], strides = [1, 1]} : vector<8x256xf32> to vector<1x256xf32>
    %108 = vector.extract_strided_slice %11 {offsets = [3, 0], sizes = [1, 256], strides = [1, 1]} : vector<8x256xf32> to vector<1x256xf32>
    %109 = arith.select %4, %107, %108 : vector<1x256xi1>, vector<1x256xf32>
    %cst_36 = arith.constant dense<0.000000e+00> : vector<1x256xf32>
    %110 = tpu.matmul %102, %7, %cst_36 {dimension_numbers = #tpu.dot_dimension_numbers<[1], [0], [0], [1], [0, 0, 1, 1], [], []>} : vector<1x64xf32>, vector<64x256xf32>, vector<1x256xf32> -> vector<1x256xf32>
    %111 = arith.addf %109, %110 : vector<1x256xf32>
    %112 = math.tanh %111 : vector<1x256xf32>
    %113 = vector.extract_strided_slice %112 {offsets = [0, 0], sizes = [1, 64], strides = [1, 1]} : vector<1x256xf32> to vector<1x64xf32>
    %cst_37 = arith.constant 5.000000e-01 : f32
    %114 = vector.broadcast %cst_37 : f32 to vector<1x64xf32>
    %115 = arith.mulf %113, %114 : vector<1x64xf32>
    %cst_38 = arith.constant 5.000000e-01 : f32
    %116 = vector.broadcast %cst_38 : f32 to vector<1x64xf32>
    %117 = arith.addf %115, %116 : vector<1x64xf32>
    %118 = vector.extract_strided_slice %112 {offsets = [0, 64], sizes = [1, 64], strides = [1, 1]} : vector<1x256xf32> to vector<1x64xf32>
    %cst_39 = arith.constant 5.000000e-01 : f32
    %119 = vector.broadcast %cst_39 : f32 to vector<1x64xf32>
    %120 = arith.mulf %118, %119 : vector<1x64xf32>
    %cst_40 = arith.constant 5.000000e-01 : f32
    %121 = vector.broadcast %cst_40 : f32 to vector<1x64xf32>
    %122 = arith.addf %120, %121 : vector<1x64xf32>
    %123 = vector.extract_strided_slice %112 {offsets = [0, 128], sizes = [1, 64], strides = [1, 1]} : vector<1x256xf32> to vector<1x64xf32>
    %124 = vector.extract_strided_slice %112 {offsets = [0, 192], sizes = [1, 64], strides = [1, 1]} : vector<1x256xf32> to vector<1x64xf32>
    %cst_41 = arith.constant 5.000000e-01 : f32
    %125 = vector.broadcast %cst_41 : f32 to vector<1x64xf32>
    %126 = arith.mulf %124, %125 : vector<1x64xf32>
    %cst_42 = arith.constant 5.000000e-01 : f32
    %127 = vector.broadcast %cst_42 : f32 to vector<1x64xf32>
    %128 = arith.addf %126, %127 : vector<1x64xf32>
    %129 = arith.mulf %122, %100 : vector<1x64xf32>
    %130 = arith.mulf %117, %123 : vector<1x64xf32>
    %131 = arith.addf %129, %130 : vector<1x64xf32>
    %132 = math.tanh %131 : vector<1x64xf32>
    %133 = arith.mulf %128, %132 : vector<1x64xf32>
    %134 = vector.extract_strided_slice %133 {offsets = [0, 0], sizes = [1, 32], strides = [1, 1]} : vector<1x64xf32> to vector<1x32xf32>
    %c3 = arith.constant 3 : index
    %c0_43 = arith.constant 0 : index
    %135 = vector.load %arg5[%c3, %c0_43] : memref<8x32xf32, #tpu.memory_space<vmem>>, vector<1x32xf32>
    tpu.vector_store %arg5[%c3, %c0_43], %134 {strides = array<i32>} : memref<8x32xf32, #tpu.memory_space<vmem>>, vector<1x32xf32>,
    %136 = vector.extract_strided_slice %133 {offsets = [0, 32], sizes = [1, 32], strides = [1, 1]} : vector<1x64xf32> to vector<1x32xf32>
    %c4 = arith.constant 4 : index
    %c0_44 = arith.constant 0 : index
    %137 = vector.load %arg6[%c4, %c0_44] : memref<8x32xf32, #tpu.memory_space<vmem>>, vector<1x32xf32>
    tpu.vector_store %arg6[%c4, %c0_44], %136 {strides = array<i32>} : memref<8x32xf32, #tpu.memory_space<vmem>>, vector<1x32xf32>,
    %138 = vector.extract_strided_slice %11 {offsets = [3, 0], sizes = [1, 256], strides = [1, 1]} : vector<8x256xf32> to vector<1x256xf32>
    %139 = vector.extract_strided_slice %11 {offsets = [4, 0], sizes = [1, 256], strides = [1, 1]} : vector<8x256xf32> to vector<1x256xf32>
    %140 = arith.select %4, %138, %139 : vector<1x256xi1>, vector<1x256xf32>
    %cst_45 = arith.constant dense<0.000000e+00> : vector<1x256xf32>
    %141 = tpu.matmul %133, %7, %cst_45 {dimension_numbers = #tpu.dot_dimension_numbers<[1], [0], [0], [1], [0, 0, 1, 1], [], []>} : vector<1x64xf32>, vector<64x256xf32>, vector<1x256xf32> -> vector<1x256xf32>
    %142 = arith.addf %140, %141 : vector<1x256xf32>
    %143 = math.tanh %142 : vector<1x256xf32>
    %144 = vector.extract_strided_slice %143 {offsets = [0, 0], sizes = [1, 64], strides = [1, 1]} : vector<1x256xf32> to vector<1x64xf32>
    %cst_46 = arith.constant 5.000000e-01 : f32
    %145 = vector.broadcast %cst_46 : f32 to vector<1x64xf32>
    %146 = arith.mulf %144, %145 : vector<1x64xf32>
    %cst_47 = arith.constant 5.000000e-01 : f32
    %147 = vector.broadcast %cst_47 : f32 to vector<1x64xf32>
    %148 = arith.addf %146, %147 : vector<1x64xf32>
    %149 = vector.extract_strided_slice %143 {offsets = [0, 64], sizes = [1, 64], strides = [1, 1]} : vector<1x256xf32> to vector<1x64xf32>
    %cst_48 = arith.constant 5.000000e-01 : f32
    %150 = vector.broadcast %cst_48 : f32 to vector<1x64xf32>
    %151 = arith.mulf %149, %150 : vector<1x64xf32>
    %cst_49 = arith.constant 5.000000e-01 : f32
    %152 = vector.broadcast %cst_49 : f32 to vector<1x64xf32>
    %153 = arith.addf %151, %152 : vector<1x64xf32>
    %154 = vector.extract_strided_slice %143 {offsets = [0, 128], sizes = [1, 64], strides = [1, 1]} : vector<1x256xf32> to vector<1x64xf32>
    %155 = vector.extract_strided_slice %143 {offsets = [0, 192], sizes = [1, 64], strides = [1, 1]} : vector<1x256xf32> to vector<1x64xf32>
    %cst_50 = arith.constant 5.000000e-01 : f32
    %156 = vector.broadcast %cst_50 : f32 to vector<1x64xf32>
    %157 = arith.mulf %155, %156 : vector<1x64xf32>
    %cst_51 = arith.constant 5.000000e-01 : f32
    %158 = vector.broadcast %cst_51 : f32 to vector<1x64xf32>
    %159 = arith.addf %157, %158 : vector<1x64xf32>
    %160 = arith.mulf %153, %131 : vector<1x64xf32>
    %161 = arith.mulf %148, %154 : vector<1x64xf32>
    %162 = arith.addf %160, %161 : vector<1x64xf32>
    %163 = math.tanh %162 : vector<1x64xf32>
    %164 = arith.mulf %159, %163 : vector<1x64xf32>
    %165 = vector.extract_strided_slice %164 {offsets = [0, 0], sizes = [1, 32], strides = [1, 1]} : vector<1x64xf32> to vector<1x32xf32>
    %c4_52 = arith.constant 4 : index
    %c0_53 = arith.constant 0 : index
    %166 = vector.load %arg5[%c4_52, %c0_53] : memref<8x32xf32, #tpu.memory_space<vmem>>, vector<1x32xf32>
    tpu.vector_store %arg5[%c4_52, %c0_53], %165 {strides = array<i32>} : memref<8x32xf32, #tpu.memory_space<vmem>>, vector<1x32xf32>,
    %167 = vector.extract_strided_slice %164 {offsets = [0, 32], sizes = [1, 32], strides = [1, 1]} : vector<1x64xf32> to vector<1x32xf32>
    %c3_54 = arith.constant 3 : index
    %c0_55 = arith.constant 0 : index
    %168 = vector.load %arg6[%c3_54, %c0_55] : memref<8x32xf32, #tpu.memory_space<vmem>>, vector<1x32xf32>
    tpu.vector_store %arg6[%c3_54, %c0_55], %167 {strides = array<i32>} : memref<8x32xf32, #tpu.memory_space<vmem>>, vector<1x32xf32>,
    %169 = vector.extract_strided_slice %11 {offsets = [2, 0], sizes = [1, 256], strides = [1, 1]} : vector<8x256xf32> to vector<1x256xf32>
    %170 = vector.extract_strided_slice %11 {offsets = [5, 0], sizes = [1, 256], strides = [1, 1]} : vector<8x256xf32> to vector<1x256xf32>
    %171 = arith.select %4, %169, %170 : vector<1x256xi1>, vector<1x256xf32>
    %cst_56 = arith.constant dense<0.000000e+00> : vector<1x256xf32>
    %172 = tpu.matmul %164, %7, %cst_56 {dimension_numbers = #tpu.dot_dimension_numbers<[1], [0], [0], [1], [0, 0, 1, 1], [], []>} : vector<1x64xf32>, vector<64x256xf32>, vector<1x256xf32> -> vector<1x256xf32>
    %173 = arith.addf %171, %172 : vector<1x256xf32>
    %174 = math.tanh %173 : vector<1x256xf32>
    %175 = vector.extract_strided_slice %174 {offsets = [0, 0], sizes = [1, 64], strides = [1, 1]} : vector<1x256xf32> to vector<1x64xf32>
    %cst_57 = arith.constant 5.000000e-01 : f32
    %176 = vector.broadcast %cst_57 : f32 to vector<1x64xf32>
    %177 = arith.mulf %175, %176 : vector<1x64xf32>
    %cst_58 = arith.constant 5.000000e-01 : f32
    %178 = vector.broadcast %cst_58 : f32 to vector<1x64xf32>
    %179 = arith.addf %177, %178 : vector<1x64xf32>
    %180 = vector.extract_strided_slice %174 {offsets = [0, 64], sizes = [1, 64], strides = [1, 1]} : vector<1x256xf32> to vector<1x64xf32>
    %cst_59 = arith.constant 5.000000e-01 : f32
    %181 = vector.broadcast %cst_59 : f32 to vector<1x64xf32>
    %182 = arith.mulf %180, %181 : vector<1x64xf32>
    %cst_60 = arith.constant 5.000000e-01 : f32
    %183 = vector.broadcast %cst_60 : f32 to vector<1x64xf32>
    %184 = arith.addf %182, %183 : vector<1x64xf32>
    %185 = vector.extract_strided_slice %174 {offsets = [0, 128], sizes = [1, 64], strides = [1, 1]} : vector<1x256xf32> to vector<1x64xf32>
    %186 = vector.extract_strided_slice %174 {offsets = [0, 192], sizes = [1, 64], strides = [1, 1]} : vector<1x256xf32> to vector<1x64xf32>
    %cst_61 = arith.constant 5.000000e-01 : f32
    %187 = vector.broadcast %cst_61 : f32 to vector<1x64xf32>
    %188 = arith.mulf %186, %187 : vector<1x64xf32>
    %cst_62 = arith.constant 5.000000e-01 : f32
    %189 = vector.broadcast %cst_62 : f32 to vector<1x64xf32>
    %190 = arith.addf %188, %189 : vector<1x64xf32>
    %191 = arith.mulf %184, %162 : vector<1x64xf32>
    %192 = arith.mulf %179, %185 : vector<1x64xf32>
    %193 = arith.addf %191, %192 : vector<1x64xf32>
    %194 = math.tanh %193 : vector<1x64xf32>
    %195 = arith.mulf %190, %194 : vector<1x64xf32>
    %196 = vector.extract_strided_slice %195 {offsets = [0, 0], sizes = [1, 32], strides = [1, 1]} : vector<1x64xf32> to vector<1x32xf32>
    %c5_63 = arith.constant 5 : index
    %c0_64 = arith.constant 0 : index
    %197 = vector.load %arg5[%c5_63, %c0_64] : memref<8x32xf32, #tpu.memory_space<vmem>>, vector<1x32xf32>
    tpu.vector_store %arg5[%c5_63, %c0_64], %196 {strides = array<i32>} : memref<8x32xf32, #tpu.memory_space<vmem>>, vector<1x32xf32>,
    %198 = vector.extract_strided_slice %195 {offsets = [0, 32], sizes = [1, 32], strides = [1, 1]} : vector<1x64xf32> to vector<1x32xf32>
    %c2_65 = arith.constant 2 : index
    %c0_66 = arith.constant 0 : index
    %199 = vector.load %arg6[%c2_65, %c0_66] : memref<8x32xf32, #tpu.memory_space<vmem>>, vector<1x32xf32>
    tpu.vector_store %arg6[%c2_65, %c0_66], %198 {strides = array<i32>} : memref<8x32xf32, #tpu.memory_space<vmem>>, vector<1x32xf32>,
    %200 = vector.extract_strided_slice %11 {offsets = [1, 0], sizes = [1, 256], strides = [1, 1]} : vector<8x256xf32> to vector<1x256xf32>
    %201 = vector.extract_strided_slice %11 {offsets = [6, 0], sizes = [1, 256], strides = [1, 1]} : vector<8x256xf32> to vector<1x256xf32>
    %202 = arith.select %4, %200, %201 : vector<1x256xi1>, vector<1x256xf32>
    %cst_67 = arith.constant dense<0.000000e+00> : vector<1x256xf32>
    %203 = tpu.matmul %195, %7, %cst_67 {dimension_numbers = #tpu.dot_dimension_numbers<[1], [0], [0], [1], [0, 0, 1, 1], [], []>} : vector<1x64xf32>, vector<64x256xf32>, vector<1x256xf32> -> vector<1x256xf32>
    %204 = arith.addf %202, %203 : vector<1x256xf32>
    %205 = math.tanh %204 : vector<1x256xf32>
    %206 = vector.extract_strided_slice %205 {offsets = [0, 0], sizes = [1, 64], strides = [1, 1]} : vector<1x256xf32> to vector<1x64xf32>
    %cst_68 = arith.constant 5.000000e-01 : f32
    %207 = vector.broadcast %cst_68 : f32 to vector<1x64xf32>
    %208 = arith.mulf %206, %207 : vector<1x64xf32>
    %cst_69 = arith.constant 5.000000e-01 : f32
    %209 = vector.broadcast %cst_69 : f32 to vector<1x64xf32>
    %210 = arith.addf %208, %209 : vector<1x64xf32>
    %211 = vector.extract_strided_slice %205 {offsets = [0, 64], sizes = [1, 64], strides = [1, 1]} : vector<1x256xf32> to vector<1x64xf32>
    %cst_70 = arith.constant 5.000000e-01 : f32
    %212 = vector.broadcast %cst_70 : f32 to vector<1x64xf32>
    %213 = arith.mulf %211, %212 : vector<1x64xf32>
    %cst_71 = arith.constant 5.000000e-01 : f32
    %214 = vector.broadcast %cst_71 : f32 to vector<1x64xf32>
    %215 = arith.addf %213, %214 : vector<1x64xf32>
    %216 = vector.extract_strided_slice %205 {offsets = [0, 128], sizes = [1, 64], strides = [1, 1]} : vector<1x256xf32> to vector<1x64xf32>
    %217 = vector.extract_strided_slice %205 {offsets = [0, 192], sizes = [1, 64], strides = [1, 1]} : vector<1x256xf32> to vector<1x64xf32>
    %cst_72 = arith.constant 5.000000e-01 : f32
    %218 = vector.broadcast %cst_72 : f32 to vector<1x64xf32>
    %219 = arith.mulf %217, %218 : vector<1x64xf32>
    %cst_73 = arith.constant 5.000000e-01 : f32
    %220 = vector.broadcast %cst_73 : f32 to vector<1x64xf32>
    %221 = arith.addf %219, %220 : vector<1x64xf32>
    %222 = arith.mulf %215, %193 : vector<1x64xf32>
    %223 = arith.mulf %210, %216 : vector<1x64xf32>
    %224 = arith.addf %222, %223 : vector<1x64xf32>
    %225 = math.tanh %224 : vector<1x64xf32>
    %226 = arith.mulf %221, %225 : vector<1x64xf32>
    %227 = vector.extract_strided_slice %226 {offsets = [0, 0], sizes = [1, 32], strides = [1, 1]} : vector<1x64xf32> to vector<1x32xf32>
    %c6_74 = arith.constant 6 : index
    %c0_75 = arith.constant 0 : index
    %228 = vector.load %arg5[%c6_74, %c0_75] : memref<8x32xf32, #tpu.memory_space<vmem>>, vector<1x32xf32>
    tpu.vector_store %arg5[%c6_74, %c0_75], %227 {strides = array<i32>} : memref<8x32xf32, #tpu.memory_space<vmem>>, vector<1x32xf32>,
    %229 = vector.extract_strided_slice %226 {offsets = [0, 32], sizes = [1, 32], strides = [1, 1]} : vector<1x64xf32> to vector<1x32xf32>
    %c1_76 = arith.constant 1 : index
    %c0_77 = arith.constant 0 : index
    %230 = vector.load %arg6[%c1_76, %c0_77] : memref<8x32xf32, #tpu.memory_space<vmem>>, vector<1x32xf32>
    tpu.vector_store %arg6[%c1_76, %c0_77], %229 {strides = array<i32>} : memref<8x32xf32, #tpu.memory_space<vmem>>, vector<1x32xf32>,
    %231 = vector.extract_strided_slice %11 {offsets = [0, 0], sizes = [1, 256], strides = [1, 1]} : vector<8x256xf32> to vector<1x256xf32>
    %232 = vector.extract_strided_slice %11 {offsets = [7, 0], sizes = [1, 256], strides = [1, 1]} : vector<8x256xf32> to vector<1x256xf32>
    %233 = arith.select %4, %231, %232 : vector<1x256xi1>, vector<1x256xf32>
    %cst_78 = arith.constant dense<0.000000e+00> : vector<1x256xf32>
    %234 = tpu.matmul %226, %7, %cst_78 {dimension_numbers = #tpu.dot_dimension_numbers<[1], [0], [0], [1], [0, 0, 1, 1], [], []>} : vector<1x64xf32>, vector<64x256xf32>, vector<1x256xf32> -> vector<1x256xf32>
    %235 = arith.addf %233, %234 : vector<1x256xf32>
    %236 = math.tanh %235 : vector<1x256xf32>
    %237 = vector.extract_strided_slice %236 {offsets = [0, 0], sizes = [1, 64], strides = [1, 1]} : vector<1x256xf32> to vector<1x64xf32>
    %cst_79 = arith.constant 5.000000e-01 : f32
    %238 = vector.broadcast %cst_79 : f32 to vector<1x64xf32>
    %239 = arith.mulf %237, %238 : vector<1x64xf32>
    %cst_80 = arith.constant 5.000000e-01 : f32
    %240 = vector.broadcast %cst_80 : f32 to vector<1x64xf32>
    %241 = arith.addf %239, %240 : vector<1x64xf32>
    %242 = vector.extract_strided_slice %236 {offsets = [0, 64], sizes = [1, 64], strides = [1, 1]} : vector<1x256xf32> to vector<1x64xf32>
    %cst_81 = arith.constant 5.000000e-01 : f32
    %243 = vector.broadcast %cst_81 : f32 to vector<1x64xf32>
    %244 = arith.mulf %242, %243 : vector<1x64xf32>
    %cst_82 = arith.constant 5.000000e-01 : f32
    %245 = vector.broadcast %cst_82 : f32 to vector<1x64xf32>
    %246 = arith.addf %244, %245 : vector<1x64xf32>
    %247 = vector.extract_strided_slice %236 {offsets = [0, 128], sizes = [1, 64], strides = [1, 1]} : vector<1x256xf32> to vector<1x64xf32>
    %248 = vector.extract_strided_slice %236 {offsets = [0, 192], sizes = [1, 64], strides = [1, 1]} : vector<1x256xf32> to vector<1x64xf32>
    %cst_83 = arith.constant 5.000000e-01 : f32
    %249 = vector.broadcast %cst_83 : f32 to vector<1x64xf32>
    %250 = arith.mulf %248, %249 : vector<1x64xf32>
    %cst_84 = arith.constant 5.000000e-01 : f32
    %251 = vector.broadcast %cst_84 : f32 to vector<1x64xf32>
    %252 = arith.addf %250, %251 : vector<1x64xf32>
    %253 = arith.mulf %246, %224 : vector<1x64xf32>
    %254 = arith.mulf %241, %247 : vector<1x64xf32>
    %255 = arith.addf %253, %254 : vector<1x64xf32>
    %256 = math.tanh %255 : vector<1x64xf32>
    %257 = arith.mulf %252, %256 : vector<1x64xf32>
    %258 = vector.extract_strided_slice %257 {offsets = [0, 0], sizes = [1, 32], strides = [1, 1]} : vector<1x64xf32> to vector<1x32xf32>
    %c7_85 = arith.constant 7 : index
    %c0_86 = arith.constant 0 : index
    %259 = vector.load %arg5[%c7_85, %c0_86] : memref<8x32xf32, #tpu.memory_space<vmem>>, vector<1x32xf32>
    tpu.vector_store %arg5[%c7_85, %c0_86], %258 {strides = array<i32>} : memref<8x32xf32, #tpu.memory_space<vmem>>, vector<1x32xf32>,
    %260 = vector.extract_strided_slice %257 {offsets = [0, 32], sizes = [1, 32], strides = [1, 1]} : vector<1x64xf32> to vector<1x32xf32>
    %c0_87 = arith.constant 0 : index
    %c0_88 = arith.constant 0 : index
    %261 = vector.load %arg6[%c0_87, %c0_88] : memref<8x32xf32, #tpu.memory_space<vmem>>, vector<1x32xf32>
    tpu.vector_store %arg6[%c0_87, %c0_88], %260 {strides = array<i32>} : memref<8x32xf32, #tpu.memory_space<vmem>>, vector<1x32xf32>,
    %c0_89 = arith.constant 0 : index
    %c0_90 = arith.constant 0 : index
    %262 = vector.load %arg5[%c0_89, %c0_90] : memref<8x32xf32, #tpu.memory_space<vmem>>, vector<8x32xf32>
    %c0_91 = arith.constant 0 : index
    %c0_92 = arith.constant 0 : index
    %263 = vector.load %arg6[%c0_91, %c0_92] : memref<8x32xf32, #tpu.memory_space<vmem>>, vector<8x32xf32>
    %264 = tpu.concatenate %262, %263 in 1 : vector<8x32xf32>, vector<8x32xf32> -> vector<8x64xf32>
    %c80 = arith.constant 80 : index
    %c0_93 = arith.constant 0 : index
    %265 = vector.load %arg1[%c80, %c0_93] : memref<208x256xf32, #tpu.memory_space<vmem>>, vector<64x256xf32>
    %c144 = arith.constant 144 : index
    %c0_94 = arith.constant 0 : index
    %266 = vector.load %arg1[%c144, %c0_94] : memref<208x256xf32, #tpu.memory_space<vmem>>, vector<64x256xf32>
    %c1_95 = arith.constant 1 : index
    %c0_96 = arith.constant 0 : index
    %267 = vector.load %arg2[%c1_95, %c0_96] : memref<2x256xf32, #tpu.memory_space<vmem>>, vector<1x256xf32>
    %cst_97 = arith.constant dense<0.000000e+00> : vector<8x256xf32>
    %268 = tpu.matmul %264, %265, %cst_97 {dimension_numbers = #tpu.dot_dimension_numbers<[1], [0], [0], [1], [0, 0, 1, 1], [], []>} : vector<8x64xf32>, vector<64x256xf32>, vector<8x256xf32> -> vector<8x256xf32>
    %269 = vector.broadcast %267 : vector<1x256xf32> to vector<8x256xf32>
    %270 = arith.addf %268, %269 : vector<8x256xf32>
    %cst_98 = arith.constant 0.000000e+00 : f32
    %271 = vector.broadcast %cst_98 : f32 to vector<1x64xf32>
    %cst_99 = arith.constant 0.000000e+00 : f32
    %272 = vector.broadcast %cst_99 : f32 to vector<1x64xf32>
    %273 = vector.extract_strided_slice %270 {offsets = [7, 0], sizes = [1, 256], strides = [1, 1]} : vector<8x256xf32> to vector<1x256xf32>
    %274 = vector.extract_strided_slice %270 {offsets = [0, 0], sizes = [1, 256], strides = [1, 1]} : vector<8x256xf32> to vector<1x256xf32>
    %275 = arith.select %4, %273, %274 : vector<1x256xi1>, vector<1x256xf32>
    %cst_100 = arith.constant dense<0.000000e+00> : vector<1x256xf32>
    %276 = tpu.matmul %271, %266, %cst_100 {dimension_numbers = #tpu.dot_dimension_numbers<[1], [0], [0], [1], [0, 0, 1, 1], [], []>} : vector<1x64xf32>, vector<64x256xf32>, vector<1x256xf32> -> vector<1x256xf32>
    %277 = arith.addf %275, %276 : vector<1x256xf32>
    %278 = math.tanh %277 : vector<1x256xf32>
    %279 = vector.extract_strided_slice %278 {offsets = [0, 0], sizes = [1, 64], strides = [1, 1]} : vector<1x256xf32> to vector<1x64xf32>
    %cst_101 = arith.constant 5.000000e-01 : f32
    %280 = vector.broadcast %cst_101 : f32 to vector<1x64xf32>
    %281 = arith.mulf %279, %280 : vector<1x64xf32>
    %cst_102 = arith.constant 5.000000e-01 : f32
    %282 = vector.broadcast %cst_102 : f32 to vector<1x64xf32>
    %283 = arith.addf %281, %282 : vector<1x64xf32>
    %284 = vector.extract_strided_slice %278 {offsets = [0, 64], sizes = [1, 64], strides = [1, 1]} : vector<1x256xf32> to vector<1x64xf32>
    %cst_103 = arith.constant 5.000000e-01 : f32
    %285 = vector.broadcast %cst_103 : f32 to vector<1x64xf32>
    %286 = arith.mulf %284, %285 : vector<1x64xf32>
    %cst_104 = arith.constant 5.000000e-01 : f32
    %287 = vector.broadcast %cst_104 : f32 to vector<1x64xf32>
    %288 = arith.addf %286, %287 : vector<1x64xf32>
    %289 = vector.extract_strided_slice %278 {offsets = [0, 128], sizes = [1, 64], strides = [1, 1]} : vector<1x256xf32> to vector<1x64xf32>
    %290 = vector.extract_strided_slice %278 {offsets = [0, 192], sizes = [1, 64], strides = [1, 1]} : vector<1x256xf32> to vector<1x64xf32>
    %cst_105 = arith.constant 5.000000e-01 : f32
    %291 = vector.broadcast %cst_105 : f32 to vector<1x64xf32>
    %292 = arith.mulf %290, %291 : vector<1x64xf32>
    %cst_106 = arith.constant 5.000000e-01 : f32
    %293 = vector.broadcast %cst_106 : f32 to vector<1x64xf32>
    %294 = arith.addf %292, %293 : vector<1x64xf32>
    %295 = arith.mulf %288, %272 : vector<1x64xf32>
    %296 = arith.mulf %283, %289 : vector<1x64xf32>
    %297 = arith.addf %295, %296 : vector<1x64xf32>
    %298 = math.tanh %297 : vector<1x64xf32>
    %299 = arith.mulf %294, %298 : vector<1x64xf32>
    %300 = vector.extract_strided_slice %299 {offsets = [0, 0], sizes = [1, 32], strides = [1, 1]} : vector<1x64xf32> to vector<1x32xf32>
    %c0_107 = arith.constant 0 : index
    %c0_108 = arith.constant 0 : index
    %301 = vector.load %arg5[%c0_107, %c0_108] : memref<8x32xf32, #tpu.memory_space<vmem>>, vector<1x32xf32>
    tpu.vector_store %arg5[%c0_107, %c0_108], %300 {strides = array<i32>} : memref<8x32xf32, #tpu.memory_space<vmem>>, vector<1x32xf32>,
    %302 = vector.extract_strided_slice %299 {offsets = [0, 32], sizes = [1, 32], strides = [1, 1]} : vector<1x64xf32> to vector<1x32xf32>
    %c7_109 = arith.constant 7 : index
    %c0_110 = arith.constant 0 : index
    %303 = vector.load %arg6[%c7_109, %c0_110] : memref<8x32xf32, #tpu.memory_space<vmem>>, vector<1x32xf32>
    tpu.vector_store %arg6[%c7_109, %c0_110], %302 {strides = array<i32>} : memref<8x32xf32, #tpu.memory_space<vmem>>, vector<1x32xf32>,
    %304 = vector.extract_strided_slice %270 {offsets = [6, 0], sizes = [1, 256], strides = [1, 1]} : vector<8x256xf32> to vector<1x256xf32>
    %305 = vector.extract_strided_slice %270 {offsets = [1, 0], sizes = [1, 256], strides = [1, 1]} : vector<8x256xf32> to vector<1x256xf32>
    %306 = arith.select %4, %304, %305 : vector<1x256xi1>, vector<1x256xf32>
    %cst_111 = arith.constant dense<0.000000e+00> : vector<1x256xf32>
    %307 = tpu.matmul %299, %266, %cst_111 {dimension_numbers = #tpu.dot_dimension_numbers<[1], [0], [0], [1], [0, 0, 1, 1], [], []>} : vector<1x64xf32>, vector<64x256xf32>, vector<1x256xf32> -> vector<1x256xf32>
    %308 = arith.addf %306, %307 : vector<1x256xf32>
    %309 = math.tanh %308 : vector<1x256xf32>
    %310 = vector.extract_strided_slice %309 {offsets = [0, 0], sizes = [1, 64], strides = [1, 1]} : vector<1x256xf32> to vector<1x64xf32>
    %cst_112 = arith.constant 5.000000e-01 : f32
    %311 = vector.broadcast %cst_112 : f32 to vector<1x64xf32>
    %312 = arith.mulf %310, %311 : vector<1x64xf32>
    %cst_113 = arith.constant 5.000000e-01 : f32
    %313 = vector.broadcast %cst_113 : f32 to vector<1x64xf32>
    %314 = arith.addf %312, %313 : vector<1x64xf32>
    %315 = vector.extract_strided_slice %309 {offsets = [0, 64], sizes = [1, 64], strides = [1, 1]} : vector<1x256xf32> to vector<1x64xf32>
    %cst_114 = arith.constant 5.000000e-01 : f32
    %316 = vector.broadcast %cst_114 : f32 to vector<1x64xf32>
    %317 = arith.mulf %315, %316 : vector<1x64xf32>
    %cst_115 = arith.constant 5.000000e-01 : f32
    %318 = vector.broadcast %cst_115 : f32 to vector<1x64xf32>
    %319 = arith.addf %317, %318 : vector<1x64xf32>
    %320 = vector.extract_strided_slice %309 {offsets = [0, 128], sizes = [1, 64], strides = [1, 1]} : vector<1x256xf32> to vector<1x64xf32>
    %321 = vector.extract_strided_slice %309 {offsets = [0, 192], sizes = [1, 64], strides = [1, 1]} : vector<1x256xf32> to vector<1x64xf32>
    %cst_116 = arith.constant 5.000000e-01 : f32
    %322 = vector.broadcast %cst_116 : f32 to vector<1x64xf32>
    %323 = arith.mulf %321, %322 : vector<1x64xf32>
    %cst_117 = arith.constant 5.000000e-01 : f32
    %324 = vector.broadcast %cst_117 : f32 to vector<1x64xf32>
    %325 = arith.addf %323, %324 : vector<1x64xf32>
    %326 = arith.mulf %319, %297 : vector<1x64xf32>
    %327 = arith.mulf %314, %320 : vector<1x64xf32>
    %328 = arith.addf %326, %327 : vector<1x64xf32>
    %329 = math.tanh %328 : vector<1x64xf32>
    %330 = arith.mulf %325, %329 : vector<1x64xf32>
    %331 = vector.extract_strided_slice %330 {offsets = [0, 0], sizes = [1, 32], strides = [1, 1]} : vector<1x64xf32> to vector<1x32xf32>
    %c1_118 = arith.constant 1 : index
    %c0_119 = arith.constant 0 : index
    %332 = vector.load %arg5[%c1_118, %c0_119] : memref<8x32xf32, #tpu.memory_space<vmem>>, vector<1x32xf32>
    tpu.vector_store %arg5[%c1_118, %c0_119], %331 {strides = array<i32>} : memref<8x32xf32, #tpu.memory_space<vmem>>, vector<1x32xf32>,
    %333 = vector.extract_strided_slice %330 {offsets = [0, 32], sizes = [1, 32], strides = [1, 1]} : vector<1x64xf32> to vector<1x32xf32>
    %c6_120 = arith.constant 6 : index
    %c0_121 = arith.constant 0 : index
    %334 = vector.load %arg6[%c6_120, %c0_121] : memref<8x32xf32, #tpu.memory_space<vmem>>, vector<1x32xf32>
    tpu.vector_store %arg6[%c6_120, %c0_121], %333 {strides = array<i32>} : memref<8x32xf32, #tpu.memory_space<vmem>>, vector<1x32xf32>,
    %335 = vector.extract_strided_slice %270 {offsets = [5, 0], sizes = [1, 256], strides = [1, 1]} : vector<8x256xf32> to vector<1x256xf32>
    %336 = vector.extract_strided_slice %270 {offsets = [2, 0], sizes = [1, 256], strides = [1, 1]} : vector<8x256xf32> to vector<1x256xf32>
    %337 = arith.select %4, %335, %336 : vector<1x256xi1>, vector<1x256xf32>
    %cst_122 = arith.constant dense<0.000000e+00> : vector<1x256xf32>
    %338 = tpu.matmul %330, %266, %cst_122 {dimension_numbers = #tpu.dot_dimension_numbers<[1], [0], [0], [1], [0, 0, 1, 1], [], []>} : vector<1x64xf32>, vector<64x256xf32>, vector<1x256xf32> -> vector<1x256xf32>
    %339 = arith.addf %337, %338 : vector<1x256xf32>
    %340 = math.tanh %339 : vector<1x256xf32>
    %341 = vector.extract_strided_slice %340 {offsets = [0, 0], sizes = [1, 64], strides = [1, 1]} : vector<1x256xf32> to vector<1x64xf32>
    %cst_123 = arith.constant 5.000000e-01 : f32
    %342 = vector.broadcast %cst_123 : f32 to vector<1x64xf32>
    %343 = arith.mulf %341, %342 : vector<1x64xf32>
    %cst_124 = arith.constant 5.000000e-01 : f32
    %344 = vector.broadcast %cst_124 : f32 to vector<1x64xf32>
    %345 = arith.addf %343, %344 : vector<1x64xf32>
    %346 = vector.extract_strided_slice %340 {offsets = [0, 64], sizes = [1, 64], strides = [1, 1]} : vector<1x256xf32> to vector<1x64xf32>
    %cst_125 = arith.constant 5.000000e-01 : f32
    %347 = vector.broadcast %cst_125 : f32 to vector<1x64xf32>
    %348 = arith.mulf %346, %347 : vector<1x64xf32>
    %cst_126 = arith.constant 5.000000e-01 : f32
    %349 = vector.broadcast %cst_126 : f32 to vector<1x64xf32>
    %350 = arith.addf %348, %349 : vector<1x64xf32>
    %351 = vector.extract_strided_slice %340 {offsets = [0, 128], sizes = [1, 64], strides = [1, 1]} : vector<1x256xf32> to vector<1x64xf32>
    %352 = vector.extract_strided_slice %340 {offsets = [0, 192], sizes = [1, 64], strides = [1, 1]} : vector<1x256xf32> to vector<1x64xf32>
    %cst_127 = arith.constant 5.000000e-01 : f32
    %353 = vector.broadcast %cst_127 : f32 to vector<1x64xf32>
    %354 = arith.mulf %352, %353 : vector<1x64xf32>
    %cst_128 = arith.constant 5.000000e-01 : f32
    %355 = vector.broadcast %cst_128 : f32 to vector<1x64xf32>
    %356 = arith.addf %354, %355 : vector<1x64xf32>
    %357 = arith.mulf %350, %328 : vector<1x64xf32>
    %358 = arith.mulf %345, %351 : vector<1x64xf32>
    %359 = arith.addf %357, %358 : vector<1x64xf32>
    %360 = math.tanh %359 : vector<1x64xf32>
    %361 = arith.mulf %356, %360 : vector<1x64xf32>
    %362 = vector.extract_strided_slice %361 {offsets = [0, 0], sizes = [1, 32], strides = [1, 1]} : vector<1x64xf32> to vector<1x32xf32>
    %c2_129 = arith.constant 2 : index
    %c0_130 = arith.constant 0 : index
    %363 = vector.load %arg5[%c2_129, %c0_130] : memref<8x32xf32, #tpu.memory_space<vmem>>, vector<1x32xf32>
    tpu.vector_store %arg5[%c2_129, %c0_130], %362 {strides = array<i32>} : memref<8x32xf32, #tpu.memory_space<vmem>>, vector<1x32xf32>,
    %364 = vector.extract_strided_slice %361 {offsets = [0, 32], sizes = [1, 32], strides = [1, 1]} : vector<1x64xf32> to vector<1x32xf32>
    %c5_131 = arith.constant 5 : index
    %c0_132 = arith.constant 0 : index
    %365 = vector.load %arg6[%c5_131, %c0_132] : memref<8x32xf32, #tpu.memory_space<vmem>>, vector<1x32xf32>
    tpu.vector_store %arg6[%c5_131, %c0_132], %364 {strides = array<i32>} : memref<8x32xf32, #tpu.memory_space<vmem>>, vector<1x32xf32>,
    %366 = vector.extract_strided_slice %270 {offsets = [4, 0], sizes = [1, 256], strides = [1, 1]} : vector<8x256xf32> to vector<1x256xf32>
    %367 = vector.extract_strided_slice %270 {offsets = [3, 0], sizes = [1, 256], strides = [1, 1]} : vector<8x256xf32> to vector<1x256xf32>
    %368 = arith.select %4, %366, %367 : vector<1x256xi1>, vector<1x256xf32>
    %cst_133 = arith.constant dense<0.000000e+00> : vector<1x256xf32>
    %369 = tpu.matmul %361, %266, %cst_133 {dimension_numbers = #tpu.dot_dimension_numbers<[1], [0], [0], [1], [0, 0, 1, 1], [], []>} : vector<1x64xf32>, vector<64x256xf32>, vector<1x256xf32> -> vector<1x256xf32>
    %370 = arith.addf %368, %369 : vector<1x256xf32>
    %371 = math.tanh %370 : vector<1x256xf32>
    %372 = vector.extract_strided_slice %371 {offsets = [0, 0], sizes = [1, 64], strides = [1, 1]} : vector<1x256xf32> to vector<1x64xf32>
    %cst_134 = arith.constant 5.000000e-01 : f32
    %373 = vector.broadcast %cst_134 : f32 to vector<1x64xf32>
    %374 = arith.mulf %372, %373 : vector<1x64xf32>
    %cst_135 = arith.constant 5.000000e-01 : f32
    %375 = vector.broadcast %cst_135 : f32 to vector<1x64xf32>
    %376 = arith.addf %374, %375 : vector<1x64xf32>
    %377 = vector.extract_strided_slice %371 {offsets = [0, 64], sizes = [1, 64], strides = [1, 1]} : vector<1x256xf32> to vector<1x64xf32>
    %cst_136 = arith.constant 5.000000e-01 : f32
    %378 = vector.broadcast %cst_136 : f32 to vector<1x64xf32>
    %379 = arith.mulf %377, %378 : vector<1x64xf32>
    %cst_137 = arith.constant 5.000000e-01 : f32
    %380 = vector.broadcast %cst_137 : f32 to vector<1x64xf32>
    %381 = arith.addf %379, %380 : vector<1x64xf32>
    %382 = vector.extract_strided_slice %371 {offsets = [0, 128], sizes = [1, 64], strides = [1, 1]} : vector<1x256xf32> to vector<1x64xf32>
    %383 = vector.extract_strided_slice %371 {offsets = [0, 192], sizes = [1, 64], strides = [1, 1]} : vector<1x256xf32> to vector<1x64xf32>
    %cst_138 = arith.constant 5.000000e-01 : f32
    %384 = vector.broadcast %cst_138 : f32 to vector<1x64xf32>
    %385 = arith.mulf %383, %384 : vector<1x64xf32>
    %cst_139 = arith.constant 5.000000e-01 : f32
    %386 = vector.broadcast %cst_139 : f32 to vector<1x64xf32>
    %387 = arith.addf %385, %386 : vector<1x64xf32>
    %388 = arith.mulf %381, %359 : vector<1x64xf32>
    %389 = arith.mulf %376, %382 : vector<1x64xf32>
    %390 = arith.addf %388, %389 : vector<1x64xf32>
    %391 = math.tanh %390 : vector<1x64xf32>
    %392 = arith.mulf %387, %391 : vector<1x64xf32>
    %393 = vector.extract_strided_slice %392 {offsets = [0, 0], sizes = [1, 32], strides = [1, 1]} : vector<1x64xf32> to vector<1x32xf32>
    %c3_140 = arith.constant 3 : index
    %c0_141 = arith.constant 0 : index
    %394 = vector.load %arg5[%c3_140, %c0_141] : memref<8x32xf32, #tpu.memory_space<vmem>>, vector<1x32xf32>
    tpu.vector_store %arg5[%c3_140, %c0_141], %393 {strides = array<i32>} : memref<8x32xf32, #tpu.memory_space<vmem>>, vector<1x32xf32>,
    %395 = vector.extract_strided_slice %392 {offsets = [0, 32], sizes = [1, 32], strides = [1, 1]} : vector<1x64xf32> to vector<1x32xf32>
    %c4_142 = arith.constant 4 : index
    %c0_143 = arith.constant 0 : index
    %396 = vector.load %arg6[%c4_142, %c0_143] : memref<8x32xf32, #tpu.memory_space<vmem>>, vector<1x32xf32>
    tpu.vector_store %arg6[%c4_142, %c0_143], %395 {strides = array<i32>} : memref<8x32xf32, #tpu.memory_space<vmem>>, vector<1x32xf32>,
    %397 = vector.extract_strided_slice %270 {offsets = [3, 0], sizes = [1, 256], strides = [1, 1]} : vector<8x256xf32> to vector<1x256xf32>
    %398 = vector.extract_strided_slice %270 {offsets = [4, 0], sizes = [1, 256], strides = [1, 1]} : vector<8x256xf32> to vector<1x256xf32>
    %399 = arith.select %4, %397, %398 : vector<1x256xi1>, vector<1x256xf32>
    %cst_144 = arith.constant dense<0.000000e+00> : vector<1x256xf32>
    %400 = tpu.matmul %392, %266, %cst_144 {dimension_numbers = #tpu.dot_dimension_numbers<[1], [0], [0], [1], [0, 0, 1, 1], [], []>} : vector<1x64xf32>, vector<64x256xf32>, vector<1x256xf32> -> vector<1x256xf32>
    %401 = arith.addf %399, %400 : vector<1x256xf32>
    %402 = math.tanh %401 : vector<1x256xf32>
    %403 = vector.extract_strided_slice %402 {offsets = [0, 0], sizes = [1, 64], strides = [1, 1]} : vector<1x256xf32> to vector<1x64xf32>
    %cst_145 = arith.constant 5.000000e-01 : f32
    %404 = vector.broadcast %cst_145 : f32 to vector<1x64xf32>
    %405 = arith.mulf %403, %404 : vector<1x64xf32>
    %cst_146 = arith.constant 5.000000e-01 : f32
    %406 = vector.broadcast %cst_146 : f32 to vector<1x64xf32>
    %407 = arith.addf %405, %406 : vector<1x64xf32>
    %408 = vector.extract_strided_slice %402 {offsets = [0, 64], sizes = [1, 64], strides = [1, 1]} : vector<1x256xf32> to vector<1x64xf32>
    %cst_147 = arith.constant 5.000000e-01 : f32
    %409 = vector.broadcast %cst_147 : f32 to vector<1x64xf32>
    %410 = arith.mulf %408, %409 : vector<1x64xf32>
    %cst_148 = arith.constant 5.000000e-01 : f32
    %411 = vector.broadcast %cst_148 : f32 to vector<1x64xf32>
    %412 = arith.addf %410, %411 : vector<1x64xf32>
    %413 = vector.extract_strided_slice %402 {offsets = [0, 128], sizes = [1, 64], strides = [1, 1]} : vector<1x256xf32> to vector<1x64xf32>
    %414 = vector.extract_strided_slice %402 {offsets = [0, 192], sizes = [1, 64], strides = [1, 1]} : vector<1x256xf32> to vector<1x64xf32>
    %cst_149 = arith.constant 5.000000e-01 : f32
    %415 = vector.broadcast %cst_149 : f32 to vector<1x64xf32>
    %416 = arith.mulf %414, %415 : vector<1x64xf32>
    %cst_150 = arith.constant 5.000000e-01 : f32
    %417 = vector.broadcast %cst_150 : f32 to vector<1x64xf32>
    %418 = arith.addf %416, %417 : vector<1x64xf32>
    %419 = arith.mulf %412, %390 : vector<1x64xf32>
    %420 = arith.mulf %407, %413 : vector<1x64xf32>
    %421 = arith.addf %419, %420 : vector<1x64xf32>
    %422 = math.tanh %421 : vector<1x64xf32>
    %423 = arith.mulf %418, %422 : vector<1x64xf32>
    %424 = vector.extract_strided_slice %423 {offsets = [0, 0], sizes = [1, 32], strides = [1, 1]} : vector<1x64xf32> to vector<1x32xf32>
    %c4_151 = arith.constant 4 : index
    %c0_152 = arith.constant 0 : index
    %425 = vector.load %arg5[%c4_151, %c0_152] : memref<8x32xf32, #tpu.memory_space<vmem>>, vector<1x32xf32>
    tpu.vector_store %arg5[%c4_151, %c0_152], %424 {strides = array<i32>} : memref<8x32xf32, #tpu.memory_space<vmem>>, vector<1x32xf32>,
    %426 = vector.extract_strided_slice %423 {offsets = [0, 32], sizes = [1, 32], strides = [1, 1]} : vector<1x64xf32> to vector<1x32xf32>
    %c3_153 = arith.constant 3 : index
    %c0_154 = arith.constant 0 : index
    %427 = vector.load %arg6[%c3_153, %c0_154] : memref<8x32xf32, #tpu.memory_space<vmem>>, vector<1x32xf32>
    tpu.vector_store %arg6[%c3_153, %c0_154], %426 {strides = array<i32>} : memref<8x32xf32, #tpu.memory_space<vmem>>, vector<1x32xf32>,
    %428 = vector.extract_strided_slice %270 {offsets = [2, 0], sizes = [1, 256], strides = [1, 1]} : vector<8x256xf32> to vector<1x256xf32>
    %429 = vector.extract_strided_slice %270 {offsets = [5, 0], sizes = [1, 256], strides = [1, 1]} : vector<8x256xf32> to vector<1x256xf32>
    %430 = arith.select %4, %428, %429 : vector<1x256xi1>, vector<1x256xf32>
    %cst_155 = arith.constant dense<0.000000e+00> : vector<1x256xf32>
    %431 = tpu.matmul %423, %266, %cst_155 {dimension_numbers = #tpu.dot_dimension_numbers<[1], [0], [0], [1], [0, 0, 1, 1], [], []>} : vector<1x64xf32>, vector<64x256xf32>, vector<1x256xf32> -> vector<1x256xf32>
    %432 = arith.addf %430, %431 : vector<1x256xf32>
    %433 = math.tanh %432 : vector<1x256xf32>
    %434 = vector.extract_strided_slice %433 {offsets = [0, 0], sizes = [1, 64], strides = [1, 1]} : vector<1x256xf32> to vector<1x64xf32>
    %cst_156 = arith.constant 5.000000e-01 : f32
    %435 = vector.broadcast %cst_156 : f32 to vector<1x64xf32>
    %436 = arith.mulf %434, %435 : vector<1x64xf32>
    %cst_157 = arith.constant 5.000000e-01 : f32
    %437 = vector.broadcast %cst_157 : f32 to vector<1x64xf32>
    %438 = arith.addf %436, %437 : vector<1x64xf32>
    %439 = vector.extract_strided_slice %433 {offsets = [0, 64], sizes = [1, 64], strides = [1, 1]} : vector<1x256xf32> to vector<1x64xf32>
    %cst_158 = arith.constant 5.000000e-01 : f32
    %440 = vector.broadcast %cst_158 : f32 to vector<1x64xf32>
    %441 = arith.mulf %439, %440 : vector<1x64xf32>
    %cst_159 = arith.constant 5.000000e-01 : f32
    %442 = vector.broadcast %cst_159 : f32 to vector<1x64xf32>
    %443 = arith.addf %441, %442 : vector<1x64xf32>
    %444 = vector.extract_strided_slice %433 {offsets = [0, 128], sizes = [1, 64], strides = [1, 1]} : vector<1x256xf32> to vector<1x64xf32>
    %445 = vector.extract_strided_slice %433 {offsets = [0, 192], sizes = [1, 64], strides = [1, 1]} : vector<1x256xf32> to vector<1x64xf32>
    %cst_160 = arith.constant 5.000000e-01 : f32
    %446 = vector.broadcast %cst_160 : f32 to vector<1x64xf32>
    %447 = arith.mulf %445, %446 : vector<1x64xf32>
    %cst_161 = arith.constant 5.000000e-01 : f32
    %448 = vector.broadcast %cst_161 : f32 to vector<1x64xf32>
    %449 = arith.addf %447, %448 : vector<1x64xf32>
    %450 = arith.mulf %443, %421 : vector<1x64xf32>
    %451 = arith.mulf %438, %444 : vector<1x64xf32>
    %452 = arith.addf %450, %451 : vector<1x64xf32>
    %453 = math.tanh %452 : vector<1x64xf32>
    %454 = arith.mulf %449, %453 : vector<1x64xf32>
    %455 = vector.extract_strided_slice %454 {offsets = [0, 0], sizes = [1, 32], strides = [1, 1]} : vector<1x64xf32> to vector<1x32xf32>
    %c5_162 = arith.constant 5 : index
    %c0_163 = arith.constant 0 : index
    %456 = vector.load %arg5[%c5_162, %c0_163] : memref<8x32xf32, #tpu.memory_space<vmem>>, vector<1x32xf32>
    tpu.vector_store %arg5[%c5_162, %c0_163], %455 {strides = array<i32>} : memref<8x32xf32, #tpu.memory_space<vmem>>, vector<1x32xf32>,
    %457 = vector.extract_strided_slice %454 {offsets = [0, 32], sizes = [1, 32], strides = [1, 1]} : vector<1x64xf32> to vector<1x32xf32>
    %c2_164 = arith.constant 2 : index
    %c0_165 = arith.constant 0 : index
    %458 = vector.load %arg6[%c2_164, %c0_165] : memref<8x32xf32, #tpu.memory_space<vmem>>, vector<1x32xf32>
    tpu.vector_store %arg6[%c2_164, %c0_165], %457 {strides = array<i32>} : memref<8x32xf32, #tpu.memory_space<vmem>>, vector<1x32xf32>,
    %459 = vector.extract_strided_slice %270 {offsets = [1, 0], sizes = [1, 256], strides = [1, 1]} : vector<8x256xf32> to vector<1x256xf32>
    %460 = vector.extract_strided_slice %270 {offsets = [6, 0], sizes = [1, 256], strides = [1, 1]} : vector<8x256xf32> to vector<1x256xf32>
    %461 = arith.select %4, %459, %460 : vector<1x256xi1>, vector<1x256xf32>
    %cst_166 = arith.constant dense<0.000000e+00> : vector<1x256xf32>
    %462 = tpu.matmul %454, %266, %cst_166 {dimension_numbers = #tpu.dot_dimension_numbers<[1], [0], [0], [1], [0, 0, 1, 1], [], []>} : vector<1x64xf32>, vector<64x256xf32>, vector<1x256xf32> -> vector<1x256xf32>
    %463 = arith.addf %461, %462 : vector<1x256xf32>
    %464 = math.tanh %463 : vector<1x256xf32>
    %465 = vector.extract_strided_slice %464 {offsets = [0, 0], sizes = [1, 64], strides = [1, 1]} : vector<1x256xf32> to vector<1x64xf32>
    %cst_167 = arith.constant 5.000000e-01 : f32
    %466 = vector.broadcast %cst_167 : f32 to vector<1x64xf32>
    %467 = arith.mulf %465, %466 : vector<1x64xf32>
    %cst_168 = arith.constant 5.000000e-01 : f32
    %468 = vector.broadcast %cst_168 : f32 to vector<1x64xf32>
    %469 = arith.addf %467, %468 : vector<1x64xf32>
    %470 = vector.extract_strided_slice %464 {offsets = [0, 64], sizes = [1, 64], strides = [1, 1]} : vector<1x256xf32> to vector<1x64xf32>
    %cst_169 = arith.constant 5.000000e-01 : f32
    %471 = vector.broadcast %cst_169 : f32 to vector<1x64xf32>
    %472 = arith.mulf %470, %471 : vector<1x64xf32>
    %cst_170 = arith.constant 5.000000e-01 : f32
    %473 = vector.broadcast %cst_170 : f32 to vector<1x64xf32>
    %474 = arith.addf %472, %473 : vector<1x64xf32>
    %475 = vector.extract_strided_slice %464 {offsets = [0, 128], sizes = [1, 64], strides = [1, 1]} : vector<1x256xf32> to vector<1x64xf32>
    %476 = vector.extract_strided_slice %464 {offsets = [0, 192], sizes = [1, 64], strides = [1, 1]} : vector<1x256xf32> to vector<1x64xf32>
    %cst_171 = arith.constant 5.000000e-01 : f32
    %477 = vector.broadcast %cst_171 : f32 to vector<1x64xf32>
    %478 = arith.mulf %476, %477 : vector<1x64xf32>
    %cst_172 = arith.constant 5.000000e-01 : f32
    %479 = vector.broadcast %cst_172 : f32 to vector<1x64xf32>
    %480 = arith.addf %478, %479 : vector<1x64xf32>
    %481 = arith.mulf %474, %452 : vector<1x64xf32>
    %482 = arith.mulf %469, %475 : vector<1x64xf32>
    %483 = arith.addf %481, %482 : vector<1x64xf32>
    %484 = math.tanh %483 : vector<1x64xf32>
    %485 = arith.mulf %480, %484 : vector<1x64xf32>
    %486 = vector.extract_strided_slice %485 {offsets = [0, 0], sizes = [1, 32], strides = [1, 1]} : vector<1x64xf32> to vector<1x32xf32>
    %c6_173 = arith.constant 6 : index
    %c0_174 = arith.constant 0 : index
    %487 = vector.load %arg5[%c6_173, %c0_174] : memref<8x32xf32, #tpu.memory_space<vmem>>, vector<1x32xf32>
    tpu.vector_store %arg5[%c6_173, %c0_174], %486 {strides = array<i32>} : memref<8x32xf32, #tpu.memory_space<vmem>>, vector<1x32xf32>,
    %488 = vector.extract_strided_slice %485 {offsets = [0, 32], sizes = [1, 32], strides = [1, 1]} : vector<1x64xf32> to vector<1x32xf32>
    %c1_175 = arith.constant 1 : index
    %c0_176 = arith.constant 0 : index
    %489 = vector.load %arg6[%c1_175, %c0_176] : memref<8x32xf32, #tpu.memory_space<vmem>>, vector<1x32xf32>
    tpu.vector_store %arg6[%c1_175, %c0_176], %488 {strides = array<i32>} : memref<8x32xf32, #tpu.memory_space<vmem>>, vector<1x32xf32>,
    %490 = vector.extract_strided_slice %270 {offsets = [0, 0], sizes = [1, 256], strides = [1, 1]} : vector<8x256xf32> to vector<1x256xf32>
    %491 = vector.extract_strided_slice %270 {offsets = [7, 0], sizes = [1, 256], strides = [1, 1]} : vector<8x256xf32> to vector<1x256xf32>
    %492 = arith.select %4, %490, %491 : vector<1x256xi1>, vector<1x256xf32>
    %cst_177 = arith.constant dense<0.000000e+00> : vector<1x256xf32>
    %493 = tpu.matmul %485, %266, %cst_177 {dimension_numbers = #tpu.dot_dimension_numbers<[1], [0], [0], [1], [0, 0, 1, 1], [], []>} : vector<1x64xf32>, vector<64x256xf32>, vector<1x256xf32> -> vector<1x256xf32>
    %494 = arith.addf %492, %493 : vector<1x256xf32>
    %495 = math.tanh %494 : vector<1x256xf32>
    %496 = vector.extract_strided_slice %495 {offsets = [0, 0], sizes = [1, 64], strides = [1, 1]} : vector<1x256xf32> to vector<1x64xf32>
    %cst_178 = arith.constant 5.000000e-01 : f32
    %497 = vector.broadcast %cst_178 : f32 to vector<1x64xf32>
    %498 = arith.mulf %496, %497 : vector<1x64xf32>
    %cst_179 = arith.constant 5.000000e-01 : f32
    %499 = vector.broadcast %cst_179 : f32 to vector<1x64xf32>
    %500 = arith.addf %498, %499 : vector<1x64xf32>
    %501 = vector.extract_strided_slice %495 {offsets = [0, 64], sizes = [1, 64], strides = [1, 1]} : vector<1x256xf32> to vector<1x64xf32>
    %cst_180 = arith.constant 5.000000e-01 : f32
    %502 = vector.broadcast %cst_180 : f32 to vector<1x64xf32>
    %503 = arith.mulf %501, %502 : vector<1x64xf32>
    %cst_181 = arith.constant 5.000000e-01 : f32
    %504 = vector.broadcast %cst_181 : f32 to vector<1x64xf32>
    %505 = arith.addf %503, %504 : vector<1x64xf32>
    %506 = vector.extract_strided_slice %495 {offsets = [0, 128], sizes = [1, 64], strides = [1, 1]} : vector<1x256xf32> to vector<1x64xf32>
    %507 = vector.extract_strided_slice %495 {offsets = [0, 192], sizes = [1, 64], strides = [1, 1]} : vector<1x256xf32> to vector<1x64xf32>
    %cst_182 = arith.constant 5.000000e-01 : f32
    %508 = vector.broadcast %cst_182 : f32 to vector<1x64xf32>
    %509 = arith.mulf %507, %508 : vector<1x64xf32>
    %cst_183 = arith.constant 5.000000e-01 : f32
    %510 = vector.broadcast %cst_183 : f32 to vector<1x64xf32>
    %511 = arith.addf %509, %510 : vector<1x64xf32>
    %512 = arith.mulf %505, %483 : vector<1x64xf32>
    %513 = arith.mulf %500, %506 : vector<1x64xf32>
    %514 = arith.addf %512, %513 : vector<1x64xf32>
    %515 = math.tanh %514 : vector<1x64xf32>
    %516 = arith.mulf %511, %515 : vector<1x64xf32>
    %517 = vector.extract_strided_slice %516 {offsets = [0, 0], sizes = [1, 32], strides = [1, 1]} : vector<1x64xf32> to vector<1x32xf32>
    %c7_184 = arith.constant 7 : index
    %c0_185 = arith.constant 0 : index
    %518 = vector.load %arg5[%c7_184, %c0_185] : memref<8x32xf32, #tpu.memory_space<vmem>>, vector<1x32xf32>
    tpu.vector_store %arg5[%c7_184, %c0_185], %517 {strides = array<i32>} : memref<8x32xf32, #tpu.memory_space<vmem>>, vector<1x32xf32>,
    %519 = vector.extract_strided_slice %516 {offsets = [0, 32], sizes = [1, 32], strides = [1, 1]} : vector<1x64xf32> to vector<1x32xf32>
    %c0_186 = arith.constant 0 : index
    %c0_187 = arith.constant 0 : index
    %520 = vector.load %arg6[%c0_186, %c0_187] : memref<8x32xf32, #tpu.memory_space<vmem>>, vector<1x32xf32>
    tpu.vector_store %arg6[%c0_186, %c0_187], %519 {strides = array<i32>} : memref<8x32xf32, #tpu.memory_space<vmem>>, vector<1x32xf32>,
    %c0_188 = arith.constant 0 : index
    %c0_189 = arith.constant 0 : index
    %521 = vector.load %arg5[%c0_188, %c0_189] : memref<8x32xf32, #tpu.memory_space<vmem>>, vector<8x32xf32>
    %c0_190 = arith.constant 0 : index
    %c0_191 = arith.constant 0 : index
    %522 = vector.load %arg6[%c0_190, %c0_191] : memref<8x32xf32, #tpu.memory_space<vmem>>, vector<8x32xf32>
    %523 = tpu.concatenate %521, %522 in 1 : vector<8x32xf32>, vector<8x32xf32> -> vector<8x64xf32>
    %c0_192 = arith.constant 0 : index
    %c0_193 = arith.constant 0 : index
    %524 = vector.load %arg3[%c0_192, %c0_193] : memref<65x3xf32, #tpu.memory_space<vmem>>, vector<64x3xf32>
    %c64 = arith.constant 64 : index
    %c0_194 = arith.constant 0 : index
    %525 = vector.load %arg3[%c64, %c0_194] : memref<65x3xf32, #tpu.memory_space<vmem>>, vector<1x3xf32>
    %cst_195 = arith.constant dense<0.000000e+00> : vector<8x3xf32>
    %526 = tpu.matmul %523, %524, %cst_195 {dimension_numbers = #tpu.dot_dimension_numbers<[1], [0], [0], [1], [0, 0, 1, 1], [], []>} : vector<8x64xf32>, vector<64x3xf32>, vector<8x3xf32> -> vector<8x3xf32>
    %527 = vector.broadcast %525 : vector<1x3xf32> to vector<8x3xf32>
    %528 = arith.addf %526, %527 : vector<8x3xf32>
    %529 = vector.extract_strided_slice %528 {offsets = [0, 0], sizes = [8, 1], strides = [1, 1]} : vector<8x3xf32> to vector<8x1xf32>
    %530 = vector.extract_strided_slice %528 {offsets = [0, 1], sizes = [8, 1], strides = [1, 1]} : vector<8x3xf32> to vector<8x1xf32>
    %531 = vector.extract_strided_slice %528 {offsets = [0, 2], sizes = [8, 1], strides = [1, 1]} : vector<8x3xf32> to vector<8x1xf32>
    %532 = arith.maximumf %529, %530 : vector<8x1xf32>
    %533 = arith.maximumf %532, %531 : vector<8x1xf32>
    %534 = arith.subf %529, %533 : vector<8x1xf32>
    %535 = math.exp %534 : vector<8x1xf32>
    %536 = arith.subf %530, %533 : vector<8x1xf32>
    %537 = math.exp %536 : vector<8x1xf32>
    %538 = arith.addf %535, %537 : vector<8x1xf32>
    %539 = arith.subf %531, %533 : vector<8x1xf32>
    %540 = math.exp %539 : vector<8x1xf32>
    %541 = arith.addf %538, %540 : vector<8x1xf32>
    %542 = math.log %541 : vector<8x1xf32>
    %543 = arith.addf %533, %542 : vector<8x1xf32>
    %544 = vector.broadcast %543 : vector<8x1xf32> to vector<8x3xf32>
    %545 = arith.subf %528, %544 : vector<8x3xf32>
    %c0_196 = arith.constant 0 : index
    %c0_197 = arith.constant 0 : index
    %546 = vector.load %arg4[%c0_196, %c0_197] : memref<8x3xf32, #tpu.memory_space<vmem>>, vector<8x3xf32>
    tpu.vector_store %arg4[%c0_196, %c0_197], %545 {strides = array<i32>} : memref<8x3xf32, #tpu.memory_space<vmem>>, vector<8x3xf32>,
    return
  }
}

</mosaic_0001>

<bundles_post_ra>
// kernel: tpu_custom_call.1
= control target key start
LH: loop header
LB: loop body
LE: loop exit
PB: predicated region body
PF: predicated region fallthrough
CT: control target
= control target key end

     0   :  { %9 = vsyncpa [#allocation5], 0  ;;  %s1786_s18 = smov [#allocation4]   ;;  %s1787_s20 = smov 256   ;;  %s2523_s0 = inlined_call_operand.vmem [shape: f32[8,16], index: 0, kind: input, shape index: {}]   ;;  %s2524_s1 = inlined_call_operand.hbm [shape: f32[208,256], index: 1, kind: input, shape index: {}]   ;;  %s2525_s2 = inlined_call_operand.vmem [shape: f32[2,256], index: 2, kind: input, shape index: {}]   ;;  %s2526_s3 = inlined_call_operand.vmem [shape: f32[65,3], index: 3, kind: input, shape index: {}]   ;;  %s2527_s4 = inlined_call_operand.vmem [shape: f32[8,3], index: 4, kind: output, shape index: {}]  }
   0x1   :  { %s16_s17 = sshll.u32 %s2524_s1, 4  ;;  %s18_s19 = sshll.u32 %s1786_s18, 4  ;;  %s17_s17 = int_to_ptr.hbm [resolvable:$true] %s16_s17  ;;  %s19_s19 = int_to_ptr.vmem [resolvable:$true] %s18_s19 }
   0x2   :  { %s1788_s21 = smov 16  }
   0x3   :  { %24 = dma.hbm_to_vmem [thread:$0]  %s17_s17, 6656, %s19_s19, [#allocation5], %s1787_s20, %s1787_s20, %s1788_s21  }
   0x4   :  { %1784 = dma.done.wait [#allocation5], 6656  }
   0x5   :  { %1785 = vsyncadd [#allocation5], 4294960640  ;;  %v1825_v0 = vld [vmem:[#allocation4 + $0x90] sm:$0xff]  ;;  %v1827_v1 = vld [vmem:[#allocation4 + $0x80] sm:$0xff]  ;;  %vm67_vm0 = vcmask 130048   ;;  %v1789_v21 = vmov 0.0   ;;  %v33_v22 = vlaneseq }
   0x6   :  { %v1829_v2 = vld [vmem:[#allocation4 + $0x98] sm:$0xff]  ;;  %131 = vmatpush.msra.mxu2 %v1825_v0  ;;  %v1833_v3 = vld [vmem:[#allocation4 + $0x88] sm:$0xff]  ;;  %v1835_v4 = vld [vmem:[#allocation4 + $0x70] sm:$0xff]  ;;  %215 = vmatpush.msra.mxu0 %v1825_v0  ;;  %s1790_s24 = smov 64   ;;  %vm119_vm3 = vcmask 523264   ;;  %s1791_s25 = smov 32  }
   0x7   :  { %151 = vmatpush.msra.mxu3 %v1829_v2  ;;  %v1837_v5 = vld [vmem:[#allocation4 + $0x78] sm:$0xff]  ;;  %v43_v6 = vld [vmem:[#allocation4 + $0x10] sm:$0xff]  ;;  %v1842_v7 = vld [vmem:[#allocation4 + $0x60] sm:$0xff]  ;;  %v34_v25 = vand.u32 127, %v33_v22  ;;  %vm190_vm4 = vcmask 261127   ;;  %vm451_vm5 = vcmask 258052  }
   0x8   :  { %132 = vmatpush.msra.mxu2 %v1827_v1  ;;  %v1844_v8 = vld [vmem:[#allocation4 + $0x68] sm:$0xff]  ;;  %85 = vmatpush.msra.mxu1 %v43_v6  ;;  %v41_v9 = vld [vmem:[#allocation4] sm:$0xff]  ;;  %v40_v10 = vld [vmem:[%s2523_s0] sm:$0xff]  ;;  %vm694_vm6 = vcmask 254977   ;;  %vm277_vm7 = vcmask 260102   ;;  %vm532_vm8 = vcmask 257027  }
   0x9   :  { %152 = vmatpush.msra.mxu3 %v1833_v3  ;;  %216 = vmatpush.msra.mxu0 %v1827_v1  ;;  %v1852_v11 = vld [vmem:[#allocation4 + $0x50] sm:$0xff]  ;;  %v1854_v12 = vld [vmem:[#allocation4 + $0x58] sm:$0xff]  ;;  %v1859_v14 = vld [vmem:[#allocation4 + $0x40] sm:$0xff]  ;;  %v35_v27 = vadd.s32 128, %v34_v25  ;;  %v36_v31 = vand.u32 63, %v34_v25  ;;  %vm364_vm9 = vcmask 259077  }
   0xa   :  { %133 = vmatpush.msra.mxu2 %v1835_v4  ;;  %86 = vmatpush.msra.mxu1 %v41_v9  ;;  %v44_v13 = vld [vmem:[#allocation4 + $0x18] sm:$0xff]  ;;  %v1862_v15 = vld [vmem:[#allocation4 + $0x48] sm:$0xff]  ;;  %v1867_v17 = vld [vmem:[#allocation4 + $0x30] sm:$0xff]  ;;  %vm613_vm10 = vcmask 256002   ;;  %vm769_vm11 = vcmask 253952   ;;  %vm781_vm12 = vcmask 261120  }
   0xb   :  { %153 = vmatpush.msra.mxu3 %v1837_v5  ;;  %217 = vmatpush.msra.mxu0 %v1835_v4  ;;  %v42_v16 = vld [vmem:[#allocation4 + $0x8] sm:$0xff]  ;;  %v1869_v18 = vld [vmem:[#allocation4 + $0x38] sm:$0xff]  ;;  %v1874_v19 = vld [vmem:[#allocation4 + $0x20] sm:$0xff]  ;;  %v37_v32 = vand.u32 63, %v35_v27  ;;  %vm1953_vm1 = vcmp.ge.s32.totalorder %v36_v31, 32  ;;  %s1792_s19 = smov 126  }
   0xc   :  { %134 = vmatpush.msra.mxu2 %v1842_v7  ;;  %1608 = vmatmul.msk.f32.vlgmr.msra.gmra.mxu1 %vm67_vm0, %v40_v10  ;;  %v1876_v20 = vld [vmem:[#allocation4 + $0x28] sm:$0xff]  ;;  %v61_v24 = vld [vmem:[%s2525_s2] ss:$2 sm:$0x3]  ;;  %s1793_s20 = smov 127   ;;  %s1794_s21 = smov 2  }
   0xd   :  { %154 = vmatpush.msra.mxu3 %v1844_v8  ;;  %218 = vmatpush.msra.mxu0 %v1842_v7  ;;  %v63_v26 = vperm.slane %v61_v24, 0  ;;  %v64_v28 = vperm.slane %v61_v24, 1  ;;  %vm1957_vm2 = vcmp.ge.s32.totalorder %v37_v32, 32  ;;  %s1795_s1 = smov 1   ;;  %vm1601_vm13 = vcmask 23552  }
   0xe   :  { %135 = vmatpush.msra.mxu2 %v1852_v11  ;;  %105 = vmatpush.msrb.mxu1 %v44_v13 }
   0xf   :  { %155 = vmatpush.msra.mxu3 %v1854_v12  ;;  %219 = vmatpush.msra.mxu0 %v1852_v11 }
  0x10   :  { %136 = vmatpush.msra.mxu2 %v1859_v14  ;;  %106 = vmatpush.msrb.mxu1 %v42_v16 }
  0x11   :  { %156 = vmatpush.msra.mxu3 %v1862_v15  ;;  %220 = vmatpush.msra.mxu0 %v1859_v14 }
  0x12   :  { %137 = vmatpush.msra.mxu2 %v1867_v17  ;;  %235 = vmatpush.msra.mxu1 %v1829_v2 }
  0x13   :  { %157 = vmatpush.msra.mxu3 %v1869_v18  ;;  %221 = vmatpush.msra.mxu0 %v1867_v17 }
  0x14   :  { %138 = vmatpush.msra.mxu2 %v1874_v19  ;;  %1609 = vmatmul.msk.f32.vlgmr.msrb.gmra.mxu1 %vm67_vm0, %v40_v10 }
  0x15   :  { %158 = vmatpush.msra.mxu3 %v1876_v20  ;;  %139 = vmatmul.f32.vlgmr.msra.gmra.mxu2 %v1789_v21 }
  0x16   :  { %159 = vmatmul.f32.vlgmr.msra.gmra.mxu3 %v1789_v21  ;;  %222 = vmatpush.msra.mxu0 %v1874_v19 }
  0x17   :  { %236 = vmatpush.msra.mxu1 %v1833_v3  ;;  %302 = vmatpush.msrb.mxu2 %v1825_v0 }
  0x18   :  { %322 = vmatpush.msrb.mxu3 %v1829_v2  ;;  %389 = vmatpush.msrb.mxu0 %v1825_v0 }
  0x19   :  { %237 = vmatpush.msra.mxu1 %v1837_v5  ;;  %303 = vmatpush.msrb.mxu2 %v1827_v1 }
  0x1a   :  { %323 = vmatpush.msrb.mxu3 %v1833_v3  ;;  %390 = vmatpush.msrb.mxu0 %v1827_v1 }
  0x1b   :  { %238 = vmatpush.msra.mxu1 %v1844_v8  ;;  %304 = vmatpush.msrb.mxu2 %v1835_v4 }
  0x1c   :  { %324 = vmatpush.msrb.mxu3 %v1837_v5  ;;  %391 = vmatpush.msrb.mxu0 %v1835_v4 }
  0x1d   :  { %239 = vmatpush.msra.mxu1 %v1854_v12  ;;  %305 = vmatpush.msrb.mxu2 %v1842_v7 }
  0x1e   :  { %325 = vmatpush.msrb.mxu3 %v1844_v8  ;;  %392 = vmatpush.msrb.mxu0 %v1842_v7 }
  0x1f   :  { %240 = vmatpush.msra.mxu1 %v1862_v15  ;;  %306 = vmatpush.msrb.mxu2 %v1852_v11 }
  0x20   :  { %326 = vmatpush.msrb.mxu3 %v1854_v12  ;;  %393 = vmatpush.msrb.mxu0 %v1852_v11 }
  0x21   :  { %241 = vmatpush.msra.mxu1 %v1869_v18  ;;  %307 = vmatpush.msrb.mxu2 %v1859_v14 }
  0x22   :  { %327 = vmatpush.msrb.mxu3 %v1862_v15  ;;  %394 = vmatpush.msrb.mxu0 %v1859_v14 }
  0x23   :  { %242 = vmatpush.msra.mxu1 %v1876_v20  ;;  %308 = vmatpush.msrb.mxu2 %v1867_v17 }
  0x24   :  { %328 = vmatpush.msrb.mxu3 %v1869_v18  ;;  %395 = vmatpush.msrb.mxu0 %v1867_v17 }
  0x25   :  { %409 = vmatpush.msrb.mxu1 %v1829_v2  ;;  %309 = vmatpush.msrb.mxu2 %v1874_v19 }
  0x26   :  { %329 = vmatpush.msrb.mxu3 %v1876_v20  ;;  %396 = vmatpush.msrb.mxu0 %v1874_v19 }
  0x27   :  { %410 = vmatpush.msrb.mxu1 %v1833_v3  ;;  %470 = vmatpush.msra.mxu2 %v1825_v0 }
  0x28   :  { %490 = vmatpush.msra.mxu3 %v1829_v2 }
  0x29   :  { %411 = vmatpush.msrb.mxu1 %v1837_v5  ;;  %471 = vmatpush.msra.mxu2 %v1827_v1 }
  0x2a   :  { %491 = vmatpush.msra.mxu3 %v1833_v3 }
  0x2b   :  { %412 = vmatpush.msrb.mxu1 %v1844_v8  ;;  %472 = vmatpush.msra.mxu2 %v1835_v4 }
  0x2c   :  { %492 = vmatpush.msra.mxu3 %v1837_v5 }
  0x2d   :  { %413 = vmatpush.msrb.mxu1 %v1854_v12  ;;  %473 = vmatpush.msra.mxu2 %v1842_v7 }
  0x2e   :  { %493 = vmatpush.msra.mxu3 %v1844_v8 }
  0x2f   :  { %414 = vmatpush.msrb.mxu1 %v1862_v15  ;;  %474 = vmatpush.msra.mxu2 %v1852_v11 }
  0x30   :  { %494 = vmatpush.msra.mxu3 %v1854_v12 }
  0x31   :  { %415 = vmatpush.msrb.mxu1 %v1869_v18  ;;  %475 = vmatpush.msra.mxu2 %v1859_v14 }
  0x32   :  { %495 = vmatpush.msra.mxu3 %v1862_v15 }
  0x33   :  { %416 = vmatpush.msrb.mxu1 %v1876_v20  ;;  %476 = vmatpush.msra.mxu2 %v1867_v17 }
  0x34   :  { %496 = vmatpush.msra.mxu3 %v1869_v18 }
  0x35   :  { %477 = vmatpush.msra.mxu2 %v1874_v19 }
  0x36   :  { %497 = vmatpush.msra.mxu3 %v1876_v20 }
  0x89   :  { %v88_v23 = vpop.f32.mrf.mxu1 }
  0x8a   :  { %v1947_v29 = vadd.f32 %v88_v23, %v63_v26 }
  0x8c   :  { %v113_v34 = vrot.slane %v1947_v29, 1  ;;  %v196_v60 = vrot.slane %v1947_v29, 3 }
  0x8e   :  { %v1964_v42 = vsel %vm1953_vm1, %v1947_v29, %v113_v34  ;;  %v2001_v10 = vsel %vm1953_vm1, %v1947_v29, %v196_v60 }
  0x91   :  { %v108_v30 = vpop.f32.mrf.mxu1 }
  0x92   :  { %v1949_v33 = vadd.f32 %v108_v30, %v64_v28 }
  0x94   :  { %v114_v35 = vrot.slane %v1949_v33, 1  ;;  %v197_v62 = vrot.slane %v1949_v33, 3 }
  0x96   :  { %v1969_v43 = vsel %vm1957_vm2, %v1949_v33, %v114_v35  ;;  %v2007_v16 = vsel %vm1957_vm2, %v1949_v33, %v197_v62 }
  0x98   :  { %v140_v38 = vpop.f32.mrf.mxu2 }
  0x99   :  { %v160_v39 = vpop.f32.mrf.mxu3  ;;  %v165_v40 = vrot.slane %v140_v38, 1 }
  0x9a   :  { %v166_v41 = vrot.slane %v160_v39, 1 }
  0x9b   :  { %v169_v44 = vadd.f32 %v165_v40, %v1964_v42 }
  0x9c   :  { %v170_v45 = vadd.f32 %v166_v41, %v1969_v43 }
  0x9d   :  { %1656 = vtanh.f32 %v169_v44  ;;  %v283_v44 = vrot.slane %v1947_v29, 5 }
  0x9e   :  { %1658 = vtanh.f32 %v170_v45 }
  0xa3   :  { %v1657_v46 = vpop.eup %1656 }
  0xa4   :  { %v173_v47 = vmul.f32 0.5, %v1657_v46  ;;  %v1659_v49 = vpop.eup %1658  ;;  %v284_v46 = vrot.slane %v1949_v33, 5 }
  0xa5   :  { %v175_v54 = vmul.f32 0.5, %v1659_v49 }
  0xa6   :  { %v174_v48 = vadd.f32 0.5, %v173_v47 }
  0xa7   :  { %v176_v55 = vadd.f32 0.5, %v175_v54 }
  0xa8   :  { %v178_v50 = vmul.f32 %v1659_v49, %v174_v48  ;;  %v177_v51 = vmul.f32 0.0, %v174_v48 }
  0xaa   :  { %180 = vrot.lane.b32.xlu0 %v178_v50, %s1790_s24  ;;  %v2038_v50 = vsel %vm1953_vm1, %v1947_v29, %v283_v44 }
 0x11c   :  { %v181_v52 = vpop.permute.xlu0 %180 }
 0x11d   :  { %v183_v53 = vadd.f32 %v181_v52, %v177_v51  ;;  %v2044_v52 = vsel %vm1957_vm2, %v1949_v33, %v284_v46 }
 0x11f   :  { %1660 = vtanh.f32 %v183_v53  ;;  %v262_v25 = vrot.slane %v183_v53, 1 }
 0x125   :  { %v1661_v56 = vpop.eup %1660 }
 0x126   :  { %v1974_v57 = vmul.f32 %v1661_v56, %v176_v55 }
 0x128   :  { %v202_v58 = vrot.slane %v1974_v57, 7 }
 0x12a   :  { %203 = vrot.lane.b32.xlu0 %v202_v58, %s1790_s24 }
 0x19c   :  { %v204_v59 = vpop.permute.xlu0 %203 }
 0x19d   :  { %1610 = vmatmul.msk.f32.vlgmr.msra.gmra.mxu0 %vm119_vm3, %v204_v59  ;;  %1611 = vmatmul.msk.f32.vlgmr.msra.gmra.mxu1 %vm119_vm3, %v204_v59 }
 0x19e   :  { %551 = vmatpush.msra.mxu0 %v1825_v0  ;;  %571 = vmatpush.msra.mxu1 %v1829_v2 }
 0x1a0   :  { %552 = vmatpush.msra.mxu0 %v1827_v1  ;;  %572 = vmatpush.msra.mxu1 %v1833_v3 }
 0x1a2   :  { %553 = vmatpush.msra.mxu0 %v1835_v4  ;;  %573 = vmatpush.msra.mxu1 %v1837_v5 }
 0x1a4   :  { %554 = vmatpush.msra.mxu0 %v1842_v7  ;;  %574 = vmatpush.msra.mxu1 %v1844_v8 }
 0x1a6   :  { %555 = vmatpush.msra.mxu0 %v1852_v11  ;;  %575 = vmatpush.msra.mxu1 %v1854_v12 }
 0x1a8   :  { %556 = vmatpush.msra.mxu0 %v1859_v14  ;;  %576 = vmatpush.msra.mxu1 %v1862_v15 }
 0x1aa   :  { %557 = vmatpush.msra.mxu0 %v1867_v17  ;;  %577 = vmatpush.msra.mxu1 %v1869_v18 }
 0x1ac   :  { %558 = vmatpush.msra.mxu0 %v1874_v19  ;;  %578 = vmatpush.msra.mxu1 %v1876_v20 }
 0x21a   :  { %v224_v61 = vpop.f32.mrf.mxu0  ;;  %v244_v63 = vpop.f32.mrf.mxu1 }
 0x21b   :  { %v249_v6 = vrot.slane %v224_v61, 2  ;;  %v250_v9 = vrot.slane %v244_v63, 2 }
 0x21d   :  { %v253_v13 = vadd.f32 %v249_v6, %v2001_v10  ;;  %v254_v22 = vadd.f32 %v250_v9, %v2007_v16 }
 0x21f   :  { %1662 = vtanh.f32 %v253_v13 }
 0x220   :  { %1664 = vtanh.f32 %v254_v22 }
 0x225   :  { %v1663_v23 = vpop.eup %1662 }
 0x226   :  { %v257_v24 = vmul.f32 0.5, %v1663_v23  ;;  %v1665_v27 = vpop.eup %1664 }
 0x227   :  { %v259_v34 = vmul.f32 0.5, %v1665_v27 }
 0x228   :  { %v258_v26 = vadd.f32 0.5, %v257_v24 }
 0x229   :  { %v260_v35 = vadd.f32 0.5, %v259_v34 }
 0x22a   :  { %v265_v28 = vmul.f32 %v1665_v27, %v258_v26  ;;  %v264_v30 = vmul.f32 %v262_v25, %v258_v26 }
 0x22c   :  { %267 = vrot.lane.b32.xlu1 %v265_v28, %s1790_s24 }
 0x29e   :  { %v268_v31 = vpop.permute.xlu1 %267 }
 0x29f   :  { %v270_v32 = vadd.f32 %v268_v31, %v264_v30 }
 0x2a1   :  { %1666 = vtanh.f32 %v270_v32  ;;  %v349_v56 = vrot.slane %v270_v32, 1 }
 0x2a7   :  { %v1667_v38 = vpop.eup %1666 }
 0x2a8   :  { %v2011_v39 = vmul.f32 %v1667_v38, %v260_v35 }
 0x2aa   :  { %v289_v40 = vrot.slane %v2011_v39, 6 }
 0x2ac   :  { %290 = vrot.lane.b32.xlu1 %v289_v40, %s1790_s24 }
 0x31e   :  { %v291_v41 = vpop.permute.xlu1 %290 }
 0x31f   :  { %1612 = vmatmul.msk.f32.vlgmr.msrb.gmra.mxu2 %vm119_vm3, %v291_v41  ;;  %1613 = vmatmul.msk.f32.vlgmr.msrb.gmra.mxu3 %vm119_vm3, %v291_v41 }
 0x320   :  { %632 = vmatpush.msrb.mxu2 %v1825_v0  ;;  %652 = vmatpush.msrb.mxu3 %v1829_v2 }
 0x322   :  { %633 = vmatpush.msrb.mxu2 %v1827_v1  ;;  %653 = vmatpush.msrb.mxu3 %v1833_v3 }
 0x324   :  { %634 = vmatpush.msrb.mxu2 %v1835_v4  ;;  %654 = vmatpush.msrb.mxu3 %v1837_v5 }
 0x326   :  { %635 = vmatpush.msrb.mxu2 %v1842_v7  ;;  %655 = vmatpush.msrb.mxu3 %v1844_v8 }
 0x328   :  { %636 = vmatpush.msrb.mxu2 %v1852_v11  ;;  %656 = vmatpush.msrb.mxu3 %v1854_v12 }
 0x32a   :  { %637 = vmatpush.msrb.mxu2 %v1859_v14  ;;  %657 = vmatpush.msrb.mxu3 %v1862_v15 }
 0x32c   :  { %638 = vmatpush.msrb.mxu2 %v1867_v17  ;;  %658 = vmatpush.msrb.mxu3 %v1869_v18 }
 0x32e   :  { %639 = vmatpush.msrb.mxu2 %v1874_v19  ;;  %659 = vmatpush.msrb.mxu3 %v1876_v20 }
 0x3a2   :  { %v311_v45 = vpop.f32.mrf.mxu2  ;;  %v331_v47 = vpop.f32.mrf.mxu3 }
 0x3a3   :  { %v336_v48 = vrot.slane %v311_v45, 3  ;;  %v337_v49 = vrot.slane %v331_v47, 3 }
 0x3a5   :  { %v340_v51 = vadd.f32 %v336_v48, %v2038_v50  ;;  %v341_v53 = vadd.f32 %v337_v49, %v2044_v52 }
 0x3a7   :  { %1668 = vtanh.f32 %v340_v51 }
 0x3a8   :  { %1670 = vtanh.f32 %v341_v53 }
 0x3ad   :  { %v1669_v54 = vpop.eup %1668 }
 0x3ae   :  { %v344_v55 = vmul.f32 0.5, %v1669_v54  ;;  %v1671_v59 = vpop.eup %1670 }
 0x3af   :  { %v346_v6 = vmul.f32 0.5, %v1671_v59 }
 0x3b0   :  { %v345_v58 = vadd.f32 0.5, %v344_v55 }
 0x3b1   :  { %v347_v9 = vadd.f32 0.5, %v346_v6 }
 0x3b2   :  { %v352_v60 = vmul.f32 %v1671_v59, %v345_v58  ;;  %v351_v61 = vmul.f32 %v349_v56, %v345_v58 }
 0x3b4   :  { %354 = vrot.lane.b32.xlu2 %v352_v60, %s1790_s24 }
 0x40e   :  { %v355_v62 = vpop.permute.xlu2 %354 }
 0x40f   :  { %v357_v63 = vadd.f32 %v355_v62, %v351_v61 }
 0x411   :  { %1672 = vtanh.f32 %v357_v63 }
 0x417   :  { %v1673_v13 = vpop.eup %1672 }
 0x418   :  { %v2048_v22 = vmul.f32 %v1673_v13, %v347_v9 }
 0x41a   :  { %v376_v23 = vrot.slane %v2048_v22, 5 }
 0x41c   :  { %377 = vrot.lane.b32.xlu2 %v376_v23, %s1790_s24 }
 0x476   :  { %v378_v24 = vpop.permute.xlu2 %377 }
 0x477   :  { %1614 = vmatmul.msk.f32.vlgmr.msrb.gmra.mxu0 %vm119_vm3, %v378_v24  ;;  %1615 = vmatmul.msk.f32.vlgmr.msrb.gmra.mxu1 %vm119_vm3, %v378_v24 }
 0x478   :  { %713 = vmatpush.msrb.mxu0 %v1825_v0  ;;  %733 = vmatpush.msrb.mxu1 %v1829_v2  ;;  %v370_v0 = vrot.slane %v1947_v29, 7  ;;  %v371_v2 = vrot.slane %v1949_v33, 7 }
 0x47a   :  { %714 = vmatpush.msrb.mxu0 %v1827_v1  ;;  %734 = vmatpush.msrb.mxu1 %v1833_v3 }
 0x47c   :  { %715 = vmatpush.msrb.mxu0 %v1835_v4  ;;  %735 = vmatpush.msrb.mxu1 %v1837_v5 }
 0x47e   :  { %716 = vmatpush.msrb.mxu0 %v1842_v7  ;;  %736 = vmatpush.msrb.mxu1 %v1844_v8  ;;  %v2075_v7 = vsel %vm1953_vm1, %v1947_v29, %v370_v0 }
 0x480   :  { %717 = vmatpush.msrb.mxu0 %v1852_v11  ;;  %737 = vmatpush.msrb.mxu1 %v1854_v12  ;;  %v2081_v11 = vsel %vm1957_vm2, %v1949_v33, %v371_v2 }
 0x482   :  { %718 = vmatpush.msrb.mxu0 %v1859_v14  ;;  %738 = vmatpush.msrb.mxu1 %v1862_v15 }
 0x484   :  { %719 = vmatpush.msrb.mxu0 %v1867_v17  ;;  %739 = vmatpush.msrb.mxu1 %v1869_v18  ;;  %v436_v17 = vrot.slane %v357_v63, 1 }
 0x486   :  { %720 = vmatpush.msrb.mxu0 %v1874_v19  ;;  %740 = vmatpush.msrb.mxu1 %v1876_v20 }
 0x4f4   :  { %v398_v1 = vpop.f32.mrf.mxu0  ;;  %v418_v3 = vpop.f32.mrf.mxu1 }
 0x4f5   :  { %v423_v4 = vrot.slane %v398_v1, 4  ;;  %v424_v5 = vrot.slane %v418_v3, 4 }
 0x4f7   :  { %v427_v8 = vadd.f32 %v423_v4, %v2075_v7  ;;  %v428_v12 = vadd.f32 %v424_v5, %v2081_v11 }
 0x4f9   :  { %1674 = vtanh.f32 %v427_v8 }
 0x4fa   :  { %1676 = vtanh.f32 %v428_v12 }
 0x4ff   :  { %v1675_v14 = vpop.eup %1674 }
 0x500   :  { %v431_v15 = vmul.f32 0.5, %v1675_v14  ;;  %v1677_v19 = vpop.eup %1676 }
 0x501   :  { %v433_v27 = vmul.f32 0.5, %v1677_v19 }
 0x502   :  { %v432_v18 = vadd.f32 0.5, %v431_v15 }
 0x503   :  { %v434_v28 = vadd.f32 0.5, %v433_v27 }
 0x504   :  { %v439_v20 = vmul.f32 %v1677_v19, %v432_v18  ;;  %v438_v25 = vmul.f32 %v436_v17, %v432_v18 }
 0x506   :  { %441 = vrot.lane.b32.xlu0 %v439_v20, %s1790_s24 }
 0x578   :  { %v442_v29 = vpop.permute.xlu0 %441 }
 0x579   :  { %v444_v26 = vadd.f32 %v442_v29, %v438_v25 }
 0x57b   :  { %1678 = vtanh.f32 %v444_v26  ;;  %v517_v47 = vrot.slane %v444_v26, 1 }
 0x581   :  { %v1679_v33 = vpop.eup %1678 }
 0x582   :  { %v2085_v30 = vmul.f32 %v1679_v33, %v434_v28 }
 0x584   :  { %v457_v31 = vrot.slane %v2085_v30, 4 }
 0x586   :  { %458 = vrot.lane.b32.xlu1 %v457_v31, %s1790_s24 }
 0x5f8   :  { %v459_v32 = vpop.permute.xlu1 %458 }
 0x5f9   :  { %1616 = vmatmul.msk.f32.vlgmr.msra.gmra.mxu2 %vm119_vm3, %v459_v32  ;;  %1617 = vmatmul.msk.f32.vlgmr.msra.gmra.mxu3 %vm119_vm3, %v459_v32 }
 0x67c   :  { %v479_v34 = vpop.f32.mrf.mxu2  ;;  %v499_v35 = vpop.f32.mrf.mxu3 }
 0x67d   :  { %v504_v38 = vrot.slane %v479_v34, 5  ;;  %v505_v40 = vrot.slane %v499_v35, 5 }
 0x67f   :  { %v508_v41 = vadd.f32 %v504_v38, %v1964_v42  ;;  %v509_v44 = vadd.f32 %v505_v40, %v1969_v43 }
 0x681   :  { %1680 = vtanh.f32 %v508_v41 }
 0x682   :  { %1682 = vtanh.f32 %v509_v44 }
 0x687   :  { %v1681_v45 = vpop.eup %1680 }
 0x688   :  { %v512_v46 = vmul.f32 0.5, %v1681_v45  ;;  %v1683_v49 = vpop.eup %1682 }
 0x689   :  { %v514_v56 = vmul.f32 0.5, %v1683_v49 }
 0x68a   :  { %v513_v48 = vadd.f32 0.5, %v512_v46 }
 0x68b   :  { %v515_v58 = vadd.f32 0.5, %v514_v56 }
 0x68c   :  { %v520_v51 = vmul.f32 %v1683_v49, %v513_v48  ;;  %v519_v53 = vmul.f32 %v517_v47, %v513_v48 }
 0x68e   :  { %522 = vrot.lane.b32.xlu2 %v520_v51, %s1790_s24 }
 0x6e8   :  { %v523_v54 = vpop.permute.xlu2 %522 }
 0x6e9   :  { %v525_v55 = vadd.f32 %v523_v54, %v519_v53 }
 0x6eb   :  { %1684 = vtanh.f32 %v525_v55  ;;  %v598_v0 = vrot.slane %v525_v55, 1 }
 0x6f1   :  { %v1685_v59 = vpop.eup %1684 }
 0x6f2   :  { %v2094_v42 = vmul.f32 %v1685_v59, %v515_v58 }
 0x6f4   :  { %v538_v43 = vrot.slane %v2094_v42, 3 }
 0x6f6   :  { %539 = vrot.lane.b32.xlu0 %v538_v43, %s1790_s24 }
 0x768   :  { %v540_v60 = vpop.permute.xlu0 %539 }
 0x769   :  { %1618 = vmatmul.msk.f32.vlgmr.msra.gmra.mxu0 %vm119_vm3, %v540_v60  ;;  %1619 = vmatmul.msk.f32.vlgmr.msra.gmra.mxu1 %vm119_vm3, %v540_v60 }
 0x7e6   :  { %v560_v61 = vpop.f32.mrf.mxu0  ;;  %v580_v62 = vpop.f32.mrf.mxu1 }
 0x7e7   :  { %v585_v63 = vrot.slane %v560_v61, 6  ;;  %v586_v6 = vrot.slane %v580_v62, 6 }
 0x7e9   :  { %v589_v9 = vadd.f32 %v585_v63, %v2001_v10  ;;  %v590_v13 = vadd.f32 %v586_v6, %v2007_v16 }
 0x7eb   :  { %1686 = vtanh.f32 %v589_v9 }
 0x7ec   :  { %1688 = vtanh.f32 %v590_v13 }
 0x7f1   :  { %v1687_v23 = vpop.eup %1686 }
 0x7f2   :  { %v593_v24 = vmul.f32 0.5, %v1687_v23  ;;  %v1689_v2 = vpop.eup %1688 }
 0x7f3   :  { %v595_v12 = vmul.f32 0.5, %v1689_v2 }
 0x7f4   :  { %v594_v1 = vadd.f32 0.5, %v593_v24 }
 0x7f5   :  { %v596_v14 = vadd.f32 0.5, %v595_v12  ;;  %v793_v12 = vld [vmem:[#allocation4 + $0xf0] sm:$0xff] }
 0x7f6   :  { %v601_v3 = vmul.f32 %v1689_v2, %v594_v1  ;;  %v600_v4 = vmul.f32 %v598_v0, %v594_v1 }
 0x7f8   :  { %603 = vrot.lane.b32.xlu1 %v601_v3, %s1790_s24  ;;  %v797_v3 = vld [vmem:[#allocation4 + $0x110] sm:$0xff] }
 0x7f9   :  { %833 = vmatpush.msra.mxu2 %v797_v3 }
 0x86a   :  { %v604_v5 = vpop.permute.xlu1 %603 }
 0x86b   :  { %v606_v8 = vadd.f32 %v604_v5, %v600_v4  ;;  %v798_v4 = vld [vmem:[#allocation4 + $0x118] sm:$0xff]  ;;  %v795_v5 = vld [vmem:[#allocation4 + $0x100] sm:$0xff] }
 0x86c   :  { %853 = vmatpush.msra.mxu3 %v798_v4  ;;  %834 = vmatpush.msra.mxu2 %v795_v5 }
 0x86d   :  { %1690 = vtanh.f32 %v606_v8  ;;  %v679_v33 = vrot.slane %v606_v8, 1  ;;  %v796_v8 = vld [vmem:[#allocation4 + $0x108] sm:$0xff] }
 0x86e   :  { %854 = vmatpush.msra.mxu3 %v796_v8  ;;  %835 = vmatpush.msra.mxu2 %v793_v12 }
 0x873   :  { %v1691_v15 = vpop.eup %1690 }
 0x874   :  { %v2103_v10 = vmul.f32 %v1691_v15, %v596_v14  ;;  %v2158_v14 = vld [vmem:[#allocation4 + $0x190] sm:$0xff]  ;;  %v2160_v15 = vld [vmem:[#allocation4 + $0x198] sm:$0xff] }
 0x875   :  { %881 = vmatpush.msra.mxu0 %v2158_v14  ;;  %901 = vmatpush.msra.mxu1 %v2160_v15 }
 0x876   :  { %v619_v16 = vrot.slane %v2103_v10, 2 }
 0x878   :  { %620 = vrot.lane.b32.xlu2 %v619_v16, %s1790_s24  ;;  %v792_v16 = vld [vmem:[#allocation4 + $0xe8] sm:$0xff] }
 0x8d2   :  { %v621_v17 = vpop.permute.xlu2 %620 }
 0x8d3   :  { %1620 = vmatmul.msk.f32.vlgmr.msrb.gmra.mxu2 %vm119_vm3, %v621_v17  ;;  %1621 = vmatmul.msk.f32.vlgmr.msrb.gmra.mxu3 %vm119_vm3, %v621_v17  ;;  %v2164_v17 = vld [vmem:[#allocation4 + $0x180] sm:$0xff] }
 0x8d4   :  { %882 = vmatpush.msra.mxu0 %v2164_v17 }
 0x956   :  { %v641_v18 = vpop.f32.mrf.mxu2  ;;  %v661_v19 = vpop.f32.mrf.mxu3 }
 0x957   :  { %v666_v20 = vrot.slane %v641_v18, 7  ;;  %v667_v25 = vrot.slane %v661_v19, 7  ;;  %v789_v18 = vld [vmem:[#allocation4 + $0xd0] sm:$0xff]  ;;  %v2166_v19 = vld [vmem:[#allocation4 + $0x188] sm:$0xff] }
 0x958   :  { %902 = vmatpush.msra.mxu1 %v2166_v19 }
 0x959   :  { %v670_v29 = vadd.f32 %v666_v20, %v2038_v50  ;;  %v671_v26 = vadd.f32 %v667_v25, %v2044_v52  ;;  %v790_v20 = vld [vmem:[#allocation4 + $0xd8] sm:$0xff]  ;;  %v2170_v25 = vld [vmem:[#allocation4 + $0x170] sm:$0xff] }
 0x95a   :  { %883 = vmatpush.msra.mxu0 %v2170_v25 }
 0x95b   :  { %1692 = vtanh.f32 %v670_v29  ;;  %v2172_v29 = vld [vmem:[#allocation4 + $0x178] sm:$0xff] }
 0x95c   :  { %1694 = vtanh.f32 %v671_v26  ;;  %v787_v26 = vld [vmem:[#allocation4 + $0xc0] sm:$0xff]  ;;  %903 = vmatpush.msra.mxu1 %v2172_v29 }
 0x961   :  { %v1693_v27 = vpop.eup %1692 }
 0x962   :  { %v674_v28 = vmul.f32 0.5, %v1693_v27  ;;  %v1695_v32 = vpop.eup %1694  ;;  %v788_v27 = vld [vmem:[#allocation4 + $0xc8] sm:$0xff] }
 0x963   :  { %v676_v52 = vmul.f32 0.5, %v1695_v32 }
 0x964   :  { %v675_v31 = vadd.f32 0.5, %v674_v28  ;;  %v785_v28 = vld [vmem:[#allocation4 + $0xb0] sm:$0xff] }
 0x965   :  { %v677_v41 = vadd.f32 0.5, %v676_v52  ;;  %v784_v52 = vld [vmem:[#allocation4 + $0xa8] sm:$0xff] }
 0x966   :  { %v682_v34 = vmul.f32 %v1695_v32, %v675_v31  ;;  %v681_v35 = vmul.f32 %v679_v33, %v675_v31  ;;  %v786_v33 = vld [vmem:[#allocation4 + $0xb8] sm:$0xff] }
 0x968   :  { %684 = vrot.lane.b32.xlu0 %v682_v34, %s1790_s24 }
 0x970   :  { %192 = vrot.lane.b32.xlu0 %v1974_v57, %s1791_s25 }
 0x978   :  { %453 = vrot.lane.b32.xlu0 %v2085_v30, %s1791_s25 }
 0x9da   :  { %v685_v50 = vpop.permute.xlu0 %684 }
 0x9db   :  { %v687_v38 = vadd.f32 %v685_v50, %v681_v35 }
 0x9dd   :  { %1696 = vtanh.f32 %v687_v38  ;;  %v754_v60 = vrot.slane %v687_v38, 1  ;;  %v783_v38 = vld [vmem:[#allocation4 + $0xa0] sm:$0xff] }
 0x9e2   :  { %v193_v40 = vpop.permute.xlu0 %192 }
 0x9e3   :  { %v1697_v44 = vpop.eup %1696  ;;  %195 = vst.msk [vmem:[#allocation3] sm:$0x80] %vm190_vm4, %v193_v40  ;;  %v2181_v40 = vld [vmem:[#allocation4 + $0x160] sm:$0xff] }
 0x9e4   :  { %v689_v45 = vmul.f32 %v1697_v44, %v677_v41  ;;  %v2183_v41 = vld [vmem:[#allocation4 + $0x168] sm:$0xff]  ;;  %884 = vmatpush.msra.mxu0 %v2181_v40  ;;  %v2187_v44 = vld [vmem:[#allocation4 + $0x150] sm:$0xff] }
 0x9e5   :  { %904 = vmatpush.msra.mxu1 %v2183_v41 }
 0x9e6   :  { %696 = vrot.lane.b32.xlu0 %v689_v45, %s1791_s25  ;;  %v700_v46 = vrot.slane %v689_v45, 1  ;;  %885 = vmatpush.msra.mxu0 %v2187_v44 }
 0x9e8   :  { %701 = vrot.lane.b32.xlu1 %v700_v46, %s1790_s24  ;;  %v2191_v46 = vld [vmem:[#allocation4 + $0x140] sm:$0xff] }
 0x9e9   :  { %886 = vmatpush.msra.mxu0 %v2191_v46 }
 0x9ea   :  { %v454_v47 = vpop.permute.xlu0 %453 }
 0x9eb   :  { %456 = vst.msk [vmem:[#allocation3] sm:$0x10] %vm451_vm5, %v454_v47  ;;  %v2193_v47 = vld [vmem:[#allocation4 + $0x148] sm:$0xff] }
 0x9ee   :  { %274 = vrot.lane.b32.xlu0 %v2011_v39, %s1790_s24 }
 0x9f0   :  { %279 = vrot.lane.b32.xlu1 %v2011_v39, %s1791_s25 }
 0x9f6   :  { %529 = vrot.lane.b32.xlu0 %v2094_v42, %s1790_s24 }
 0x9f8   :  { %534 = vrot.lane.b32.xlu1 %v2094_v42, %s1791_s25 }
 0xa58   :  { %v697_v48 = vpop.permute.xlu0 %696 }
 0xa59   :  { %699 = vst.msk [vmem:[#allocation3] sm:$0x2] %vm694_vm6, %v697_v48  ;;  %v2199_v48 = vld [vmem:[#allocation4 + $0x130] sm:$0xff] }
 0xa5a   :  { %v702_v49 = vpop.permute.xlu1 %701  ;;  %887 = vmatpush.msra.mxu0 %v2199_v48 }
 0xa5b   :  { %1622 = vmatmul.msk.f32.vlgmr.msrb.gmra.mxu0 %vm119_vm3, %v702_v49  ;;  %1623 = vmatmul.msk.f32.vlgmr.msrb.gmra.mxu1 %vm119_vm3, %v702_v49  ;;  %v2201_v49 = vld [vmem:[#allocation4 + $0x138] sm:$0xff] }
 0xa60   :  { %v275_v51 = vpop.permute.xlu0 %274 }
 0xa61   :  { %278 = vst.msk [vmem:[#allocation2 - $0x5] sm:$0x40] %vm277_vm7, %v275_v51  ;;  %v2207_v51 = vld [vmem:[#allocation4 + $0x120] sm:$0xff] }
 0xa62   :  { %v280_v39 = vpop.permute.xlu1 %279  ;;  %888 = vmatpush.msra.mxu0 %v2207_v51 }
 0xa63   :  { %282 = vst.msk [vmem:[#allocation3] sm:$0x40] %vm277_vm7, %v280_v39  ;;  %v2209_v39 = vld [vmem:[#allocation4 + $0x128] sm:$0xff]  ;;  %889 = vmatmul.f32.vlgmr.msra.gmra.mxu0 %v1789_v21 }
 0xa64   :  { %1050 = vmatpush.msrb.mxu0 %v2158_v14 }
 0xa66   :  { %1051 = vmatpush.msrb.mxu0 %v2164_v17 }
 0xa68   :  { %v530_v53 = vpop.permute.xlu0 %529  ;;  %1052 = vmatpush.msrb.mxu0 %v2170_v25 }
 0xa69   :  { %533 = vst.msk [vmem:[#allocation2 + $0x1] sm:$0x8] %vm532_vm8, %v530_v53 }
 0xa6a   :  { %v535_v54 = vpop.permute.xlu1 %534  ;;  %1053 = vmatpush.msrb.mxu0 %v2181_v40 }
 0xa6b   :  { %537 = vst.msk [vmem:[#allocation3] sm:$0x8] %vm532_vm8, %v535_v54 }
 0xa6c   :  { %1054 = vmatpush.msrb.mxu0 %v2187_v44 }
 0xa6e   :  { %1055 = vmatpush.msrb.mxu0 %v2191_v46 }
 0xa70   :  { %1056 = vmatpush.msrb.mxu0 %v2199_v48 }
 0xa72   :  { %1057 = vmatpush.msrb.mxu0 %v2207_v51 }
 0xa74   :  { %1216 = vmatpush.msra.mxu0 %v2158_v14 }
 0xa76   :  { %1217 = vmatpush.msra.mxu0 %v2164_v17 }
 0xa78   :  { %1218 = vmatpush.msra.mxu0 %v2170_v25 }
 0xa7a   :  { %1219 = vmatpush.msra.mxu0 %v2181_v40 }
 0xa7c   :  { %1220 = vmatpush.msra.mxu0 %v2187_v44 }
 0xa7e   :  { %1221 = vmatpush.msra.mxu0 %v2191_v46 }
 0xa80   :  { %1222 = vmatpush.msra.mxu0 %v2199_v48 }
 0xa82   :  { %1223 = vmatpush.msra.mxu0 %v2207_v51 }
 0xad8   :  { %v722_v55 = vpop.f32.mrf.mxu0  ;;  %v742_v56 = vpop.f32.mrf.mxu1 }
 0xad9   :  { %v745_v58 = vadd.f32 %v722_v55, %v2075_v7  ;;  %v746_v59 = vadd.f32 %v742_v56, %v2081_v11  ;;  %v1624_v55 = vld [vmem:[%s2525_s2 + $0x1] ss:$2 sm:$0x3] }
 0xada   :  { %v818_v56 = vperm.slane %v1624_v55, 0 }
 0xadb   :  { %1698 = vtanh.f32 %v745_v58  ;;  %v819_v58 = vperm.slane %v1624_v55, 1 }
 0xadc   :  { %1700 = vtanh.f32 %v746_v59 }
 0xae0   :  { %v890_v59 = vpop.f32.mrf.mxu0 }
 0xae1   :  { %v1699_v42 = vpop.eup %1698 }
 0xae2   :  { %v749_v43 = vmul.f32 0.5, %v1699_v42  ;;  %v1701_v62 = vpop.eup %1700 }
 0xae3   :  { %v751_v9 = vmul.f32 0.5, %v1701_v62 }
 0xae4   :  { %v750_v61 = vadd.f32 0.5, %v749_v43 }
 0xae5   :  { %v752_v23 = vadd.f32 0.5, %v751_v9 }
 0xae6   :  { %v757_v63 = vmul.f32 %v1701_v62, %v750_v61  ;;  %v756_v6 = vmul.f32 %v754_v60, %v750_v61 }
 0xae8   :  { %759 = vrot.lane.b32.xlu2 %v757_v63, %s1790_s24  ;;  %v915_v63 = vrot.slane %v890_v59, 1 }
 0xaf0   :  { %366 = vrot.lane.b32.xlu2 %v2048_v22, %s1791_s25 }
 0xaf8   :  { %615 = vrot.lane.b32.xlu2 %v2103_v10, %s1791_s25 }
 0xb00   :  { %187 = vrot.lane.b32.xlu2 %v1974_v57, %s1790_s24 }
 0xb08   :  { %448 = vrot.lane.b32.xlu2 %v2085_v30, %s1790_s24 }
 0xb10   :  { %691 = vrot.lane.b32.xlu2 %v689_v45, %s1790_s24  ;;  %v2189_v45 = vld [vmem:[#allocation4 + $0x158] sm:$0xff] }
 0xb11   :  { %905 = vmatpush.msra.mxu1 %v2189_v45 }
 0xb13   :  { %906 = vmatpush.msra.mxu1 %v2193_v47 }
 0xb15   :  { %907 = vmatpush.msra.mxu1 %v2201_v49 }
 0xb17   :  { %908 = vmatpush.msra.mxu1 %v2209_v39 }
 0xb18   :  { %909 = vmatmul.f32.vlgmr.msra.gmra.mxu1 %v1789_v21 }
 0xb19   :  { %1070 = vmatpush.msrb.mxu1 %v2160_v15 }
 0xb1b   :  { %1071 = vmatpush.msrb.mxu1 %v2166_v19 }
 0xb1d   :  { %1072 = vmatpush.msrb.mxu1 %v2172_v29 }
 0xb1f   :  { %1073 = vmatpush.msrb.mxu1 %v2183_v41 }
 0xb21   :  { %1074 = vmatpush.msrb.mxu1 %v2189_v45 }
 0xb23   :  { %1075 = vmatpush.msrb.mxu1 %v2193_v47 }
 0xb25   :  { %1076 = vmatpush.msrb.mxu1 %v2201_v49 }
 0xb27   :  { %1077 = vmatpush.msrb.mxu1 %v2209_v39 }
 0xb29   :  { %1236 = vmatpush.msra.mxu1 %v2160_v15 }
 0xb2b   :  { %1237 = vmatpush.msra.mxu1 %v2166_v19 }
 0xb2d   :  { %1238 = vmatpush.msra.mxu1 %v2172_v29 }
 0xb2f   :  { %1239 = vmatpush.msra.mxu1 %v2183_v41 }
 0xb31   :  { %1240 = vmatpush.msra.mxu1 %v2189_v45 }
 0xb33   :  { %1241 = vmatpush.msra.mxu1 %v2193_v47 }
 0xb35   :  { %1242 = vmatpush.msra.mxu1 %v2201_v49 }
 0xb37   :  { %1243 = vmatpush.msra.mxu1 %v2209_v39 }
 0xb42   :  { %v760_v7 = vpop.permute.xlu2 %759 }
 0xb43   :  { %v762_v11 = vadd.f32 %v760_v7, %v756_v6 }
 0xb45   :  { %1702 = vtanh.f32 %v762_v11 }
 0xb4a   :  { %v367_v13 = vpop.permute.xlu2 %366 }
 0xb4b   :  { %v1703_v24 = vpop.eup %1702  ;;  %369 = vst.msk [vmem:[#allocation3] sm:$0x20] %vm364_vm9, %v367_v13 }
 0xb4c   :  { %v764_v0 = vmul.f32 %v1703_v24, %v752_v23 }
 0xb4e   :  { %766 = vrot.lane.b32.xlu0 %v764_v0, %s1790_s24  ;;  %771 = vrot.lane.b32.xlu1 %v764_v0, %s1791_s25 }
 0xb52   :  { %v616_v57 = vpop.permute.xlu2 %615 }
 0xb53   :  { %618 = vst.msk [vmem:[#allocation3] sm:$0x4] %vm613_vm10, %v616_v57 }
 0xb56   :  { %361 = vrot.lane.b32.xlu1 %v2048_v22, %s1790_s24  ;;  %v794_v22 = vld [vmem:[#allocation4 + $0xf8] sm:$0xff] }
 0xb57   :  { %855 = vmatpush.msra.mxu3 %v794_v22 }
 0xb59   :  { %856 = vmatpush.msra.mxu3 %v792_v16 }
 0xb5a   :  { %v188_v30 = vpop.permute.xlu2 %187 }
 0xb5b   :  { %191 = vst.msk [vmem:[#allocation2 - $0x7] sm:$0x80] %vm190_vm4, %v188_v30  ;;  %857 = vmatpush.msra.mxu3 %v790_v20 }
 0xb5d   :  { %858 = vmatpush.msra.mxu3 %v788_v27 }
 0xb5e   :  { %610 = vrot.lane.b32.xlu1 %v2103_v10, %s1790_s24  ;;  %v791_v10 = vld [vmem:[#allocation4 + $0xe0] sm:$0xff] }
 0xb5f   :  { %836 = vmatpush.msra.mxu2 %v791_v10  ;;  %859 = vmatpush.msra.mxu3 %v786_v33 }
 0xb61   :  { %837 = vmatpush.msra.mxu2 %v789_v18  ;;  %860 = vmatpush.msra.mxu3 %v784_v52 }
 0xb62   :  { %v449_v1 = vpop.permute.xlu2 %448 }
 0xb63   :  { %452 = vst.msk [vmem:[#allocation2 - $0x1] sm:$0x10] %vm451_vm5, %v449_v1  ;;  %838 = vmatpush.msra.mxu2 %v787_v26  ;;  %984 = vmatpush.msrb.mxu3 %v2160_v15 }
 0xb65   :  { %839 = vmatpush.msra.mxu2 %v785_v28  ;;  %985 = vmatpush.msrb.mxu3 %v2166_v19 }
 0xb67   :  { %840 = vmatpush.msra.mxu2 %v783_v38  ;;  %986 = vmatpush.msrb.mxu3 %v2172_v29 }
 0xb69   :  { %964 = vmatpush.msrb.mxu2 %v2158_v14  ;;  %987 = vmatpush.msrb.mxu3 %v2183_v41 }
 0xb6a   :  { %v692_v2 = vpop.permute.xlu2 %691 }
 0xb6b   :  { %695 = vst.msk [vmem:[#allocation2 + $0x5] sm:$0x2] %vm694_vm6, %v692_v2  ;;  %965 = vmatpush.msrb.mxu2 %v2164_v17  ;;  %988 = vmatpush.msrb.mxu3 %v2189_v45 }
 0xb6d   :  { %966 = vmatpush.msrb.mxu2 %v2170_v25  ;;  %989 = vmatpush.msrb.mxu3 %v2193_v47 }
 0xb6f   :  { %967 = vmatpush.msrb.mxu2 %v2181_v40  ;;  %990 = vmatpush.msrb.mxu3 %v2201_v49 }
 0xb71   :  { %968 = vmatpush.msrb.mxu2 %v2187_v44  ;;  %991 = vmatpush.msrb.mxu3 %v2209_v39 }
 0xb73   :  { %969 = vmatpush.msrb.mxu2 %v2191_v46 }
 0xb75   :  { %970 = vmatpush.msrb.mxu2 %v2199_v48 }
 0xb77   :  { %971 = vmatpush.msrb.mxu2 %v2207_v51 }
 0xb95   :  { %v910_v62 = vpop.f32.mrf.mxu1 }
 0xb96   :  { %v916_v11 = vrot.slane %v910_v62, 1 }
 0xbc0   :  { %v767_v31 = vpop.permute.xlu0 %766  ;;  %v772_v32 = vpop.permute.xlu1 %771 }
 0xbc1   :  { %770 = vst.msk [vmem:[#allocation2 + $0x7] sm:$0x1] %vm769_vm11, %v767_v31 }
 0xbc2   :  { %774 = vst.msk [vmem:[#allocation3] sm:$0x1] %vm769_vm11, %v772_v32 }
 0xbc8   :  { %v362_v34 = vpop.permute.xlu1 %361 }
 0xbc9   :  { %365 = vst.msk [vmem:[#allocation2 - $0x3] sm:$0x20] %vm364_vm9, %v362_v34  ;;  %v776_v35 = vld [vmem:[#allocation3] sm:$0xff] }
 0xbca   :  { %778 = vrot.lane.b32.xlu1 %v776_v35, %s1791_s25 }
 0xbd0   :  { %v611_v50 = vpop.permute.xlu1 %610 }
 0xbd1   :  { %614 = vst.msk [vmem:[#allocation2 + $0x3] sm:$0x4] %vm613_vm10, %v611_v50 }
 0xbd8   :  { %v775_v21 = vld [vmem:[#allocation2] sm:$0xff] }
 0xc3c   :  { %v779_v53 = vpop.permute.xlu1 %778 }
 0xc3d   :  { %v782_v54 = vsel %vm781_vm12, %v775_v21, %v779_v53 }
 0xc3e   :  { %1625 = vmatmul.msk.f32.vlgmr.msra.gmra.mxu2 %vm119_vm3, %v782_v54  ;;  %1626 = vmatmul.msk.f32.vlgmr.msra.gmra.mxu3 %vm119_vm3, %v782_v54 }
 0xc3f   :  { %1136 = vmatpush.msra.mxu2 %v2158_v14  ;;  %1156 = vmatpush.msra.mxu3 %v2160_v15 }
 0xc41   :  { %1137 = vmatpush.msra.mxu2 %v2164_v17  ;;  %1157 = vmatpush.msra.mxu3 %v2166_v19 }
 0xc43   :  { %1138 = vmatpush.msra.mxu2 %v2170_v25  ;;  %1158 = vmatpush.msra.mxu3 %v2172_v29 }
 0xc45   :  { %1139 = vmatpush.msra.mxu2 %v2181_v40  ;;  %1159 = vmatpush.msra.mxu3 %v2183_v41 }
 0xc47   :  { %1140 = vmatpush.msra.mxu2 %v2187_v44  ;;  %1160 = vmatpush.msra.mxu3 %v2189_v45 }
 0xc49   :  { %1141 = vmatpush.msra.mxu2 %v2191_v46  ;;  %1161 = vmatpush.msra.mxu3 %v2193_v47 }
 0xc4b   :  { %1142 = vmatpush.msra.mxu2 %v2199_v48  ;;  %1162 = vmatpush.msra.mxu3 %v2201_v49 }
 0xc4d   :  { %1143 = vmatpush.msra.mxu2 %v2207_v51  ;;  %1163 = vmatpush.msra.mxu3 %v2209_v39 }
 0xcc1   :  { %v842_v42 = vpop.f32.mrf.mxu2  ;;  %v862_v43 = vpop.f32.mrf.mxu3 }
 0xcc2   :  { %v2283_v60 = vadd.f32 %v842_v42, %v818_v56  ;;  %v2285_v61 = vadd.f32 %v862_v43, %v819_v58 }
 0xcc4   :  { %v867_v6 = vrot.slane %v2283_v60, 1  ;;  %v868_v7 = vrot.slane %v2285_v61, 1  ;;  %v945_v20 = vrot.slane %v2283_v60, 3  ;;  %v946_v27 = vrot.slane %v2285_v61, 3 }
 0xcc6   :  { %v2292_v9 = vsel %vm1953_vm1, %v2283_v60, %v867_v6  ;;  %v2297_v13 = vsel %vm1957_vm2, %v2285_v61, %v868_v7  ;;  %v2329_v32 = vsel %vm1953_vm1, %v2283_v60, %v945_v20  ;;  %v2335_v35 = vsel %vm1957_vm2, %v2285_v61, %v946_v27 }
 0xcc7   :  { %v919_v23 = vadd.f32 %v915_v63, %v2292_v9  ;;  %v920_v24 = vadd.f32 %v916_v11, %v2297_v13  ;;  %v1031_v11 = vrot.slane %v2283_v60, 5 }
 0xcc9   :  { %1704 = vtanh.f32 %v919_v23 }
 0xcca   :  { %1706 = vtanh.f32 %v920_v24  ;;  %v1032_v24 = vrot.slane %v2285_v61, 5 }
 0xccf   :  { %v1705_v0 = vpop.eup %1704 }
 0xcd0   :  { %v923_v57 = vmul.f32 0.5, %v1705_v0  ;;  %v1707_v1 = vpop.eup %1706 }
 0xcd1   :  { %v925_v8 = vmul.f32 0.5, %v1707_v1 }
 0xcd2   :  { %v924_v30 = vadd.f32 0.5, %v923_v57 }
 0xcd3   :  { %v926_v12 = vadd.f32 0.5, %v925_v8 }
 0xcd4   :  { %v928_v2 = vmul.f32 %v1707_v1, %v924_v30  ;;  %v927_v3 = vmul.f32 0.0, %v924_v30  ;;  %v2366_v1 = vsel %vm1953_vm1, %v2283_v60, %v1031_v11 }
 0xcd6   :  { %930 = vrot.lane.b32.xlu2 %v928_v2, %s1790_s24 }
 0xd30   :  { %v931_v4 = vpop.permute.xlu2 %930 }
 0xd31   :  { %v933_v5 = vadd.f32 %v931_v4, %v927_v3  ;;  %v2372_v3 = vsel %vm1957_vm2, %v2285_v61, %v1032_v24 }
 0xd33   :  { %1708 = vtanh.f32 %v933_v5  ;;  %v1011_v21 = vrot.slane %v933_v5, 1 }
 0xd39   :  { %v1709_v22 = vpop.eup %1708 }
 0xd3a   :  { %v2302_v10 = vmul.f32 %v1709_v22, %v926_v12 }
 0xd3c   :  { %v951_v16 = vrot.slane %v2302_v10, 7 }
 0xd3e   :  { %952 = vrot.lane.b32.xlu0 %v951_v16, %s1790_s24 }
 0xdb0   :  { %v953_v18 = vpop.permute.xlu0 %952 }
 0xdb1   :  { %1627 = vmatmul.msk.f32.vlgmr.msrb.gmra.mxu2 %vm119_vm3, %v953_v18  ;;  %1628 = vmatmul.msk.f32.vlgmr.msrb.gmra.mxu3 %vm119_vm3, %v953_v18 }
 0xdb2   :  { %1296 = vmatpush.msrb.mxu2 %v2158_v14  ;;  %1316 = vmatpush.msrb.mxu3 %v2160_v15 }
 0xdb4   :  { %1297 = vmatpush.msrb.mxu2 %v2164_v17  ;;  %1317 = vmatpush.msrb.mxu3 %v2166_v19 }
 0xdb6   :  { %1298 = vmatpush.msrb.mxu2 %v2170_v25  ;;  %1318 = vmatpush.msrb.mxu3 %v2172_v29 }
 0xdb8   :  { %1299 = vmatpush.msrb.mxu2 %v2181_v40  ;;  %1319 = vmatpush.msrb.mxu3 %v2183_v41 }
 0xdba   :  { %1300 = vmatpush.msrb.mxu2 %v2187_v44  ;;  %1320 = vmatpush.msrb.mxu3 %v2189_v45 }
 0xdbc   :  { %1301 = vmatpush.msrb.mxu2 %v2191_v46  ;;  %1321 = vmatpush.msrb.mxu3 %v2193_v47 }
 0xdbe   :  { %1302 = vmatpush.msrb.mxu2 %v2199_v48  ;;  %1322 = vmatpush.msrb.mxu3 %v2201_v49 }
 0xdc0   :  { %1303 = vmatpush.msrb.mxu2 %v2207_v51  ;;  %1323 = vmatpush.msrb.mxu3 %v2209_v39 }
 0xe34   :  { %v973_v26 = vpop.f32.mrf.mxu2  ;;  %v993_v28 = vpop.f32.mrf.mxu3 }
 0xe35   :  { %v998_v33 = vrot.slane %v973_v26, 2  ;;  %v999_v31 = vrot.slane %v993_v28, 2 }
 0xe37   :  { %v1002_v34 = vadd.f32 %v998_v33, %v2329_v32  ;;  %v1003_v50 = vadd.f32 %v999_v31, %v2335_v35 }
 0xe39   :  { %1710 = vtanh.f32 %v1002_v34 }
 0xe3a   :  { %1712 = vtanh.f32 %v1003_v50 }
 0xe3f   :  { %v1711_v38 = vpop.eup %1710 }
 0xe40   :  { %v1006_v52 = vmul.f32 0.5, %v1711_v38  ;;  %v1713_v54 = vpop.eup %1712 }
 0xe41   :  { %v1008_v42 = vmul.f32 0.5, %v1713_v54 }
 0xe42   :  { %v1007_v53 = vadd.f32 0.5, %v1006_v52 }
 0xe43   :  { %v1009_v43 = vadd.f32 0.5, %v1008_v42 }
 0xe44   :  { %v1014_v55 = vmul.f32 %v1713_v54, %v1007_v53  ;;  %v1013_v56 = vmul.f32 %v1011_v21, %v1007_v53 }
 0xe46   :  { %1016 = vrot.lane.b32.xlu1 %v1014_v55, %s1790_s24 }
 0xeb8   :  { %v1017_v58 = vpop.permute.xlu1 %1016 }
 0xeb9   :  { %v1019_v59 = vadd.f32 %v1017_v58, %v1013_v56 }
 0xebb   :  { %1714 = vtanh.f32 %v1019_v59  ;;  %v1097_v12 = vrot.slane %v1019_v59, 1 }
 0xec1   :  { %v1715_v62 = vpop.eup %1714 }
 0xec2   :  { %v2339_v63 = vmul.f32 %v1715_v62, %v1009_v43 }
 0xec4   :  { %v1037_v6 = vrot.slane %v2339_v63, 6 }
 0xec6   :  { %1038 = vrot.lane.b32.xlu2 %v1037_v6, %s1790_s24 }
 0xf20   :  { %v1039_v7 = vpop.permute.xlu2 %1038 }
 0xf21   :  { %1629 = vmatmul.msk.f32.vlgmr.msrb.gmra.mxu0 %vm119_vm3, %v1039_v7  ;;  %1630 = vmatmul.msk.f32.vlgmr.msrb.gmra.mxu1 %vm119_vm3, %v1039_v7 }
 0xf22   :  { %1376 = vmatpush.msrb.mxu0 %v2158_v14  ;;  %1396 = vmatpush.msrb.mxu1 %v2160_v15 }
 0xf24   :  { %1377 = vmatpush.msrb.mxu0 %v2164_v17  ;;  %1397 = vmatpush.msrb.mxu1 %v2166_v19 }
 0xf26   :  { %1378 = vmatpush.msrb.mxu0 %v2170_v25  ;;  %1398 = vmatpush.msrb.mxu1 %v2172_v29 }
 0xf28   :  { %1379 = vmatpush.msrb.mxu0 %v2181_v40  ;;  %1399 = vmatpush.msrb.mxu1 %v2183_v41 }
 0xf2a   :  { %1380 = vmatpush.msrb.mxu0 %v2187_v44  ;;  %1400 = vmatpush.msrb.mxu1 %v2189_v45 }
 0xf2c   :  { %1381 = vmatpush.msrb.mxu0 %v2191_v46  ;;  %1401 = vmatpush.msrb.mxu1 %v2193_v47 }
 0xf2e   :  { %1382 = vmatpush.msrb.mxu0 %v2199_v48  ;;  %1402 = vmatpush.msrb.mxu1 %v2201_v49 }
 0xf30   :  { %1383 = vmatpush.msrb.mxu0 %v2207_v51  ;;  %1403 = vmatpush.msrb.mxu1 %v2209_v39 }
 0xf9e   :  { %v1059_v23 = vpop.f32.mrf.mxu0  ;;  %v1079_v0 = vpop.f32.mrf.mxu1 }
 0xf9f   :  { %v1084_v57 = vrot.slane %v1059_v23, 3  ;;  %v1085_v30 = vrot.slane %v1079_v0, 3 }
 0xfa1   :  { %v1088_v2 = vadd.f32 %v1084_v57, %v2366_v1  ;;  %v1089_v4 = vadd.f32 %v1085_v30, %v2372_v3 }
 0xfa3   :  { %1716 = vtanh.f32 %v1088_v2 }
 0xfa4   :  { %1718 = vtanh.f32 %v1089_v4 }
 0xfa9   :  { %v1717_v5 = vpop.eup %1716 }
 0xfaa   :  { %v1092_v8 = vmul.f32 0.5, %v1717_v5  ;;  %v1719_v16 = vpop.eup %1718 }
 0xfab   :  { %v1094_v28 = vmul.f32 0.5, %v1719_v16 }
 0xfac   :  { %v1093_v22 = vadd.f32 0.5, %v1092_v8 }
 0xfad   :  { %v1095_v33 = vadd.f32 0.5, %v1094_v28 }
 0xfae   :  { %v1100_v18 = vmul.f32 %v1719_v16, %v1093_v22  ;;  %v1099_v20 = vmul.f32 %v1097_v12, %v1093_v22 }
 0xfb0   :  { %1102 = vrot.lane.b32.xlu0 %v1100_v18, %s1790_s24 }
0x1022   :  { %v1103_v26 = vpop.permute.xlu0 %1102 }
0x1023   :  { %v1105_v27 = vadd.f32 %v1103_v26, %v1099_v20 }
0x1025   :  { %1720 = vtanh.f32 %v1105_v27 }
0x102b   :  { %v1721_v31 = vpop.eup %1720 }
0x102c   :  { %v2376_v34 = vmul.f32 %v1721_v31, %v1095_v33 }
0x102e   :  { %v1123_v50 = vrot.slane %v2376_v34, 5 }
0x1030   :  { %1124 = vrot.lane.b32.xlu1 %v1123_v50, %s1790_s24 }
0x10a2   :  { %v1125_v38 = vpop.permute.xlu1 %1124 }
0x10a3   :  { %1631 = vmatmul.msk.f32.vlgmr.msra.gmra.mxu2 %vm119_vm3, %v1125_v38  ;;  %1632 = vmatmul.msk.f32.vlgmr.msra.gmra.mxu3 %vm119_vm3, %v1125_v38 }
0x10a4   :  { %1456 = vmatpush.msra.mxu2 %v2158_v14  ;;  %1476 = vmatpush.msra.mxu3 %v2160_v15  ;;  %v1117_v14 = vrot.slane %v2283_v60, 7 }
0x10a6   :  { %1457 = vmatpush.msra.mxu2 %v2164_v17  ;;  %1477 = vmatpush.msra.mxu3 %v2166_v19  ;;  %v1118_v17 = vrot.slane %v2285_v61, 7 }
0x10a8   :  { %1458 = vmatpush.msra.mxu2 %v2170_v25  ;;  %1478 = vmatpush.msra.mxu3 %v2172_v29 }
0x10aa   :  { %1459 = vmatpush.msra.mxu2 %v2181_v40  ;;  %1479 = vmatpush.msra.mxu3 %v2183_v41  ;;  %v2403_v40 = vsel %vm1953_vm1, %v2283_v60, %v1117_v14 }
0x10ac   :  { %1460 = vmatpush.msra.mxu2 %v2187_v44  ;;  %1480 = vmatpush.msra.mxu3 %v2189_v45  ;;  %v2409_v44 = vsel %vm1957_vm2, %v2285_v61, %v1118_v17 }
0x10ae   :  { %1461 = vmatpush.msra.mxu2 %v2191_v46  ;;  %1481 = vmatpush.msra.mxu3 %v2193_v47 }
0x10b0   :  { %1462 = vmatpush.msra.mxu2 %v2199_v48  ;;  %1482 = vmatpush.msra.mxu3 %v2201_v49  ;;  %v1183_v48 = vrot.slane %v1105_v27, 1 }
0x10b2   :  { %1463 = vmatpush.msra.mxu2 %v2207_v51  ;;  %1483 = vmatpush.msra.mxu3 %v2209_v39 }
0x1126   :  { %v1145_v15 = vpop.f32.mrf.mxu2  ;;  %v1165_v19 = vpop.f32.mrf.mxu3 }
0x1127   :  { %v1170_v25 = vrot.slane %v1145_v15, 4  ;;  %v1171_v29 = vrot.slane %v1165_v19, 4 }
0x1129   :  { %v1174_v41 = vadd.f32 %v1170_v25, %v2403_v40  ;;  %v1175_v45 = vadd.f32 %v1171_v29, %v2409_v44 }
0x112b   :  { %1722 = vtanh.f32 %v1174_v41 }
0x112c   :  { %1724 = vtanh.f32 %v1175_v45 }
0x1131   :  { %v1723_v46 = vpop.eup %1722 }
0x1132   :  { %v1178_v47 = vmul.f32 0.5, %v1723_v46  ;;  %v1725_v51 = vpop.eup %1724 }
0x1133   :  { %v1180_v21 = vmul.f32 0.5, %v1725_v51 }
0x1134   :  { %v1179_v49 = vadd.f32 0.5, %v1178_v47 }
0x1135   :  { %v1181_v37 = vadd.f32 0.5, %v1180_v21 }
0x1136   :  { %v1186_v39 = vmul.f32 %v1725_v51, %v1179_v49  ;;  %v1185_v36 = vmul.f32 %v1183_v48, %v1179_v49 }
0x1138   :  { %1188 = vrot.lane.b32.xlu2 %v1186_v39, %s1790_s24 }
0x1192   :  { %v1189_v60 = vpop.permute.xlu2 %1188 }
0x1193   :  { %v1191_v52 = vadd.f32 %v1189_v60, %v1185_v36 }
0x1195   :  { %1726 = vtanh.f32 %v1191_v52  ;;  %v1263_v11 = vrot.slane %v1191_v52, 1 }
0x119b   :  { %v1727_v61 = vpop.eup %1726 }
0x119c   :  { %v2413_v53 = vmul.f32 %v1727_v61, %v1181_v37 }
0x119e   :  { %v1203_v54 = vrot.slane %v2413_v53, 4 }
0x11a0   :  { %1204 = vrot.lane.b32.xlu0 %v1203_v54, %s1790_s24 }
0x1212   :  { %v1205_v55 = vpop.permute.xlu0 %1204 }
0x1213   :  { %1633 = vmatmul.msk.f32.vlgmr.msra.gmra.mxu0 %vm119_vm3, %v1205_v55  ;;  %1634 = vmatmul.msk.f32.vlgmr.msra.gmra.mxu1 %vm119_vm3, %v1205_v55 }
0x1290   :  { %v1225_v56 = vpop.f32.mrf.mxu0  ;;  %v1245_v58 = vpop.f32.mrf.mxu1 }
0x1291   :  { %v1250_v59 = vrot.slane %v1225_v56, 5  ;;  %v1251_v42 = vrot.slane %v1245_v58, 5 }
0x1293   :  { %v1254_v43 = vadd.f32 %v1250_v59, %v2292_v9  ;;  %v1255_v62 = vadd.f32 %v1251_v42, %v2297_v13 }
0x1295   :  { %1728 = vtanh.f32 %v1254_v43 }
0x1296   :  { %1730 = vtanh.f32 %v1255_v62 }
0x129b   :  { %v1729_v6 = vpop.eup %1728 }
0x129c   :  { %v1258_v7 = vmul.f32 0.5, %v1729_v6  ;;  %v1731_v24 = vpop.eup %1730 }
0x129d   :  { %v1260_v4 = vmul.f32 0.5, %v1731_v24 }
0x129e   :  { %v1259_v23 = vadd.f32 0.5, %v1258_v7 }
0x129f   :  { %v1261_v5 = vadd.f32 0.5, %v1260_v4 }
0x12a0   :  { %v1266_v0 = vmul.f32 %v1731_v24, %v1259_v23  ;;  %v1265_v57 = vmul.f32 %v1263_v11, %v1259_v23 }
0x12a2   :  { %1268 = vrot.lane.b32.xlu1 %v1266_v0, %s1790_s24 }
0x1314   :  { %v1269_v30 = vpop.permute.xlu1 %1268 }
0x1315   :  { %v1271_v2 = vadd.f32 %v1269_v30, %v1265_v57 }
0x1317   :  { %1732 = vtanh.f32 %v1271_v2  ;;  %v1343_v31 = vrot.slane %v1271_v2, 1 }
0x131d   :  { %v1733_v8 = vpop.eup %1732 }
0x131e   :  { %v2422_v9 = vmul.f32 %v1733_v8, %v1261_v5 }
0x1320   :  { %v1283_v13 = vrot.slane %v2422_v9, 3 }
0x1322   :  { %1284 = vrot.lane.b32.xlu2 %v1283_v13, %s1790_s24 }
0x137c   :  { %v1285_v12 = vpop.permute.xlu2 %1284 }
0x137d   :  { %1635 = vmatmul.msk.f32.vlgmr.msrb.gmra.mxu2 %vm119_vm3, %v1285_v12  ;;  %1636 = vmatmul.msk.f32.vlgmr.msrb.gmra.mxu3 %vm119_vm3, %v1285_v12 }
0x1400   :  { %v1305_v22 = vpop.f32.mrf.mxu2  ;;  %v1325_v16 = vpop.f32.mrf.mxu3 }
0x1401   :  { %v1330_v18 = vrot.slane %v1305_v22, 6  ;;  %v1331_v20 = vrot.slane %v1325_v16, 6 }
0x1403   :  { %v1334_v26 = vadd.f32 %v1330_v18, %v2329_v32  ;;  %v1335_v27 = vadd.f32 %v1331_v20, %v2335_v35 }
0x1405   :  { %1734 = vtanh.f32 %v1334_v26 }
0x1406   :  { %1736 = vtanh.f32 %v1335_v27 }
0x140b   :  { %v1735_v28 = vpop.eup %1734 }
0x140c   :  { %v1338_v33 = vmul.f32 0.5, %v1735_v28  ;;  %v1737_v38 = vpop.eup %1736 }
0x140d   :  { %v1340_v25 = vmul.f32 0.5, %v1737_v38 }
0x140e   :  { %v1339_v50 = vadd.f32 0.5, %v1338_v33 }
0x140f   :  { %v1341_v29 = vadd.f32 0.5, %v1340_v25 }
0x1410   :  { %v1346_v14 = vmul.f32 %v1737_v38, %v1339_v50  ;;  %v1345_v15 = vmul.f32 %v1343_v31, %v1339_v50  ;;  %v1531_v50 = vld [vmem:[%s2526_s3 + $0x38] sm:$0xff]  ;;  %v1529_v38 = vld [vmem:[%s2526_s3 + $0x28] sm:$0xff] }
0x1411   :  { %1545 = vmatpush.msra.mxu0 %v1531_v50 }
0x1412   :  { %1348 = vrot.lane.b32.xlu0 %v1346_v14, %s1790_s24  ;;  %v1528_v14 = vld [vmem:[%s2526_s3 + $0x20] sm:$0xff] }
0x1484   :  { %v1349_v17 = vpop.permute.xlu0 %1348 }
0x1485   :  { %v1351_v19 = vadd.f32 %v1349_v17, %v1345_v15  ;;  %v1527_v15 = vld [vmem:[%s2526_s3 + $0x18] sm:$0xff]  ;;  %v1526_v17 = vld [vmem:[%s2526_s3 + $0x10] sm:$0xff] }
0x1487   :  { %1738 = vtanh.f32 %v1351_v19  ;;  %v1423_v52 = vrot.slane %v1351_v19, 1  ;;  %v1525_v19 = vld [vmem:[%s2526_s3 + $0x8] sm:$0xff] }
0x148d   :  { %v1739_v41 = vpop.eup %1738 }
0x148e   :  { %v2431_v32 = vmul.f32 %v1739_v41, %v1341_v29 }
0x1490   :  { %v1363_v35 = vrot.slane %v2431_v32, 2 }
0x1492   :  { %1364 = vrot.lane.b32.xlu1 %v1363_v35, %s1790_s24  ;;  %v1524_v35 = vld [vmem:[%s2526_s3] sm:$0xff] }
0x1504   :  { %v1365_v45 = vpop.permute.xlu1 %1364 }
0x1505   :  { %1637 = vmatmul.msk.f32.vlgmr.msrb.gmra.mxu0 %vm119_vm3, %v1365_v45  ;;  %1638 = vmatmul.msk.f32.vlgmr.msrb.gmra.mxu1 %vm119_vm3, %v1365_v45 }
0x1582   :  { %v1385_v46 = vpop.f32.mrf.mxu0  ;;  %v1405_v47 = vpop.f32.mrf.mxu1 }
0x1583   :  { %v1410_v48 = vrot.slane %v1385_v46, 7  ;;  %v1411_v49 = vrot.slane %v1405_v47, 7 }
0x1585   :  { %v1414_v51 = vadd.f32 %v1410_v48, %v2366_v1  ;;  %v1415_v39 = vadd.f32 %v1411_v49, %v2372_v3  ;;  %v1655_v48 = vld [vmem:[%s2526_s3 + $0x40] ss:$0 sm:$0xff] }
0x1587   :  { %1740 = vtanh.f32 %v1414_v51 }
0x1588   :  { %1742 = vtanh.f32 %v1415_v39 }
0x158d   :  { %v1741_v36 = vpop.eup %1740 }
0x158e   :  { %v1418_v60 = vmul.f32 0.5, %v1741_v36  ;;  %v1743_v37 = vpop.eup %1742 }
0x158f   :  { %v1420_v3 = vmul.f32 0.5, %v1743_v37 }
0x1590   :  { %v1419_v21 = vadd.f32 0.5, %v1418_v60 }
0x1591   :  { %v1421_v58 = vadd.f32 0.5, %v1420_v3 }
0x1592   :  { %v1426_v61 = vmul.f32 %v1743_v37, %v1419_v21  ;;  %v1425_v54 = vmul.f32 %v1423_v52, %v1419_v21 }
0x1594   :  { %1428 = vrot.lane.b32.xlu2 %v1426_v61, %s1790_s24 }
0x159c   :  { %941 = vrot.lane.b32.xlu2 %v2302_v10, %s1791_s25 }
0x15a4   :  { %1199 = vrot.lane.b32.xlu2 %v2413_v53, %s1791_s25 }
0x15ee   :  { %v1429_v1 = vpop.permute.xlu2 %1428 }
0x15ef   :  { %v1431_v55 = vadd.f32 %v1429_v1, %v1425_v54 }
0x15f1   :  { %1744 = vtanh.f32 %v1431_v55  ;;  %v1497_v8 = vrot.slane %v1431_v55, 1 }
0x15f6   :  { %v942_v56 = vpop.permute.xlu2 %941 }
0x15f7   :  { %v1745_v59 = vpop.eup %1744  ;;  %944 = vst.msk [vmem:[#allocation3] sm:$0x80] %vm190_vm4, %v942_v56 }
0x15f8   :  { %v1433_v42 = vmul.f32 %v1745_v59, %v1421_v58  ;;  %v1796_v58 = vmov 0  }
0x15f9   :  { %1653 = vset.pattern.permute.xlu1 %v1796_v58  ;;  %1654 = vset.pattern.permute.xlu0 %v1796_v58 }
0x15fa   :  { %1439 = vrot.lane.b32.xlu2 %v1433_v42, %s1791_s25  ;;  %v1443_v43 = vrot.slane %v1433_v42, 1 }
0x15fc   :  { %1444 = vrot.lane.b32.xlu0 %v1443_v43, %s1790_s24 }
0x15fe   :  { %v1200_v62 = vpop.permute.xlu2 %1199 }
0x15ff   :  { %1202 = vst.msk [vmem:[#allocation3] sm:$0x10] %vm451_vm5, %v1200_v62 }
0x1602   :  { %1023 = vrot.lane.b32.xlu2 %v2339_v63, %s1790_s24 }
0x1604   :  { %1027 = vrot.lane.b32.xlu0 %v2339_v63, %s1791_s25 }
0x160a   :  { %1275 = vrot.lane.b32.xlu2 %v2422_v9, %s1790_s24 }
0x160c   :  { %1279 = vrot.lane.b32.xlu0 %v2422_v9, %s1791_s25 }
0x1654   :  { %v1440_v6 = vpop.permute.xlu2 %1439 }
0x1655   :  { %1442 = vst.msk [vmem:[#allocation3] sm:$0x2] %vm694_vm6, %v1440_v6 }
0x165c   :  { %v1024_v7 = vpop.permute.xlu2 %1023 }
0x165d   :  { %1026 = vst.msk [vmem:[#allocation2 - $0x5] sm:$0x40] %vm277_vm7, %v1024_v7 }
0x1664   :  { %v1276_v11 = vpop.permute.xlu2 %1275 }
0x1665   :  { %1278 = vst.msk [vmem:[#allocation2 + $0x1] sm:$0x8] %vm532_vm8, %v1276_v11 }
0x166e   :  { %v1445_v23 = vpop.permute.xlu0 %1444 }
0x166f   :  { %1639 = vmatmul.msk.f32.vlgmr.msra.gmra.mxu2 %vm119_vm3, %v1445_v23  ;;  %1640 = vmatmul.msk.f32.vlgmr.msra.gmra.mxu3 %vm119_vm3, %v1445_v23 }
0x1676   :  { %v1028_v63 = vpop.permute.xlu0 %1027 }
0x1677   :  { %1030 = vst.msk [vmem:[#allocation3] sm:$0x40] %vm277_vm7, %v1028_v63 }
0x167e   :  { %v1280_v24 = vpop.permute.xlu0 %1279 }
0x167f   :  { %1282 = vst.msk [vmem:[#allocation3] sm:$0x8] %vm532_vm8, %v1280_v24 }
0x16f2   :  { %v1465_v0 = vpop.f32.mrf.mxu2  ;;  %v1485_v57 = vpop.f32.mrf.mxu3 }
0x16f3   :  { %v1488_v30 = vadd.f32 %v1465_v0, %v2403_v40  ;;  %v1489_v2 = vadd.f32 %v1485_v57, %v2409_v44 }
0x16f5   :  { %1746 = vtanh.f32 %v1488_v30 }
0x16f6   :  { %1748 = vtanh.f32 %v1489_v2 }
0x16fb   :  { %v1747_v4 = vpop.eup %1746 }
0x16fc   :  { %v1492_v5 = vmul.f32 0.5, %v1747_v4  ;;  %v1749_v13 = vpop.eup %1748 }
0x16fd   :  { %v1494_v16 = vmul.f32 0.5, %v1749_v13 }
0x16fe   :  { %v1493_v9 = vadd.f32 0.5, %v1492_v5 }
0x16ff   :  { %v1495_v20 = vadd.f32 0.5, %v1494_v16 }
0x1700   :  { %v1500_v12 = vmul.f32 %v1749_v13, %v1493_v9  ;;  %v1499_v22 = vmul.f32 %v1497_v8, %v1493_v9 }
0x1702   :  { %1502 = vrot.lane.b32.xlu1 %v1500_v12, %s1790_s24 }
0x170a   :  { %1113 = vrot.lane.b32.xlu1 %v2376_v34, %s1791_s25 }
0x1712   :  { %1359 = vrot.lane.b32.xlu1 %v2431_v32, %s1791_s25 }
0x171a   :  { %937 = vrot.lane.b32.xlu1 %v2302_v10, %s1790_s24 }
0x1722   :  { %1195 = vrot.lane.b32.xlu1 %v2413_v53, %s1790_s24 }
0x172a   :  { %1435 = vrot.lane.b32.xlu1 %v1433_v42, %s1790_s24 }
0x1774   :  { %v1503_v40 = vpop.permute.xlu1 %1502 }
0x1775   :  { %v1505_v44 = vadd.f32 %v1503_v40, %v1499_v22 }
0x1777   :  { %1750 = vtanh.f32 %v1505_v44 }
0x177c   :  { %v1114_v18 = vpop.permute.xlu1 %1113 }
0x177d   :  { %v1751_v26 = vpop.eup %1750  ;;  %1116 = vst.msk [vmem:[#allocation3] sm:$0x20] %vm364_vm9, %v1114_v18 }
0x177e   :  { %v1507_v27 = vmul.f32 %v1751_v26, %v1495_v20 }
0x1780   :  { %1509 = vrot.lane.b32.xlu2 %v1507_v27, %s1790_s24  ;;  %1513 = vrot.lane.b32.xlu0 %v1507_v27, %s1791_s25 }
0x1784   :  { %v1360_v10 = vpop.permute.xlu1 %1359 }
0x1785   :  { %1362 = vst.msk [vmem:[#allocation3] sm:$0x4] %vm613_vm10, %v1360_v10 }
0x1788   :  { %1109 = vrot.lane.b32.xlu0 %v2376_v34, %s1790_s24  ;;  %v1530_v34 = vld [vmem:[%s2526_s3 + $0x30] sm:$0xff] }
0x1789   :  { %1546 = vmatpush.msra.mxu0 %v1530_v34 }
0x178b   :  { %1547 = vmatpush.msra.mxu0 %v1529_v38 }
0x178c   :  { %v938_v53 = vpop.permute.xlu1 %937 }
0x178d   :  { %940 = vst.msk [vmem:[#allocation2 - $0x7] sm:$0x80] %vm190_vm4, %v938_v53  ;;  %1548 = vmatpush.msra.mxu0 %v1528_v14 }
0x178f   :  { %1549 = vmatpush.msra.mxu0 %v1527_v15 }
0x1790   :  { %1355 = vrot.lane.b32.xlu0 %v2431_v32, %s1790_s24 }
0x1791   :  { %1550 = vmatpush.msra.mxu0 %v1526_v17 }
0x1793   :  { %1551 = vmatpush.msra.mxu0 %v1525_v19 }
0x1794   :  { %v1196_v28 = vpop.permute.xlu1 %1195 }
0x1795   :  { %1198 = vst.msk [vmem:[#allocation2 - $0x1] sm:$0x10] %vm451_vm5, %v1196_v28  ;;  %1552 = vmatpush.msra.mxu0 %v1524_v35 }
0x179c   :  { %v1436_v33 = vpop.permute.xlu1 %1435 }
0x179d   :  { %1438 = vst.msk [vmem:[#allocation2 + $0x5] sm:$0x2] %vm694_vm6, %v1436_v33 }
0x17da   :  { %v1510_v31 = vpop.permute.xlu2 %1509 }
0x17db   :  { %1512 = vst.msk [vmem:[#allocation2 + $0x7] sm:$0x1] %vm769_vm11, %v1510_v31 }
0x17f2   :  { %v1514_v25 = vpop.permute.xlu0 %1513 }
0x17f3   :  { %1516 = vst.msk [vmem:[#allocation3] sm:$0x1] %vm769_vm11, %v1514_v25 }
0x17fa   :  { %v1110_v29 = vpop.permute.xlu0 %1109  ;;  %v1518_v41 = vld [vmem:[#allocation3] sm:$0xff] }
0x17fb   :  { %1112 = vst.msk [vmem:[#allocation2 - $0x3] sm:$0x20] %vm364_vm9, %v1110_v29  ;;  %1520 = vrot.lane.b32.xlu0 %v1518_v41, %s1791_s25 }
0x1802   :  { %v1356_v32 = vpop.permute.xlu0 %1355 }
0x1803   :  { %1358 = vst.msk [vmem:[#allocation2 + $0x3] sm:$0x4] %vm613_vm10, %v1356_v32 }
0x180a   :  { %v1517_v45 = vld [vmem:[#allocation2] sm:$0xff] }
0x186d   :  { %v1521_v46 = vpop.permute.xlu0 %1520 }
0x186e   :  { %v1523_v47 = vsel %vm781_vm12, %v1517_v45, %v1521_v46 }
0x186f   :  { %1641 = vmatmul.msk.f32.vlgmr.msra.gmra.mxu0 %vm119_vm3, %v1523_v47 }
0x18ec   :  { %v1554_v49 = vpop.f32.mrf.mxu0 }
0x18ed   :  { %v1555_v51 = vadd.f32 %v1655_v48, %v1554_v49 }
0x18ef   :  { %1562 = vrot.lane.b32.xlu2 %v1555_v51, %s1792_s19  ;;  %1558 = vrot.lane.b32.xlu1 %v1555_v51, %s1793_s20 }
0x1949   :  { %v1563_v60 = vpop.permute.xlu2 %1562 }
0x1961   :  { %v1559_v39 = vpop.permute.xlu1 %1558 }
0x1962   :  { %v1561_v36 = vmax.f32 %v1555_v51, %v1559_v39 }
0x1964   :  { %v1565_v52 = vmax.f32 %v1561_v36, %v1563_v60 }
0x1966   :  { %1581 = vrot.lane.b32.xlu1 %v1565_v52, %s1794_s21  ;;  %1570 = vrot.lane.b32.xlu0 %v1565_v52, %s1795_s1  ;;  %v1566_v59 = vsub.f32 %v1555_v51, %v1565_v52 }
0x1968   :  { %v1567_v42 = vmul.f32 1.442695, %v1566_v59 }
0x19d8   :  { %v1582_v21 = vpop.permute.xlu1 %1581  ;;  %v1571_v37 = vpop.permute.xlu0 %1570 }
0x19d9   :  { %v1584_v61 = vsub.f32 %v1555_v51, %v1582_v21  ;;  %v1573_v54 = vsub.f32 %v1555_v51, %v1571_v37 }
0x19db   :  { %v1585_v1 = vmul.f32 1.442695, %v1584_v61  ;;  %v1574_v55 = vmul.f32 1.442695, %v1573_v54 }
0x19dd   :  { %1752 = vpow2.f32 %v1585_v1 }
0x19de   :  { %1754 = vpow2.f32 %v1574_v55 }
0x19df   :  { %1756 = vpow2.f32 %v1567_v42 }
0x19e3   :  { %v1753_v3 = vpop.eup %1752 }
0x19e4   :  { %v1755_v56 = vpop.eup %1754  ;;  %1588 = vrot.lane.b32.xlu0 %v1753_v3, %s1792_s19 }
0x19e5   :  { %1577 = vrot.lane.b32.xlu2 %v1755_v56, %s1793_s20  ;;  %v1757_v62 = vpop.eup %1756 }
0x1a3f   :  { %v1578_v43 = vpop.permute.xlu2 %1577 }
0x1a40   :  { %v1580_v6 = vadd.f32 %v1757_v62, %v1578_v43 }
0x1a56   :  { %v1589_v7 = vpop.permute.xlu0 %1588 }
0x1a57   :  { %v1591_v11 = vadd.f32 %v1589_v7, %v1580_v6 }
0x1a59   :  { %1758 = vlog2.f32 %v1591_v11 }
0x1a5f   :  { %v1759_v23 = vpop.eup %1758 }
0x1a60   :  { %v1593_v63 = vmul.f32 0.6931472, %v1759_v23 }
0x1a62   :  { %v1594_v24 = vadd.f32 %v1593_v63, %v1565_v52 }
0x1a64   :  { %1597 = vperm.xlu1 %1653, %v1594_v24  }
0x1ad6   :  { %v1598_v0 = vpop.permute.xlu1 %1597 }
0x1ad7   :  { %v1600_v57 = vsub.f32 %v1555_v51, %v1598_v0 }
0x1ad9   :  { %1602 = vst.msk [vmem:[%s2527_s4] sm:$0xff] %vm1601_vm13, %v1600_v57 }
0x1ada   :  { %1607 = vsyncpa [#allocation5], 1 }

</bundles_post_ra>
